<compile_context>
chip_gen: v5e
topology: v5e:2x2
jax: 0.10.0
libtpu: 0.0.40
codegen_flags: <defaults>
</compile_context>

<pallas_src>
import functools

import jax
import jax.numpy as jnp
from jax.experimental import pallas as pl
from jax.experimental.pallas import tpu as pltpu

LANE = 128


def _round_up(v, m):
    return ((v + m - 1) // m) * m


def _storage_channels(c):
    # Lane-dense channel storage: pad to a multiple of 128 once; padded lanes
    # carry zeros (zero weights / scale / bias) through the whole network.
    # TODO(synk): for very narrow layers (C << 128) this inflates HBM/MXU work
    # by ~128/C; a VPU-stencil conv path would be preferable in that regime.
    return _round_up(c, LANE)


def _tile_bytes(shape, dtype_bytes):
    """Bytes of one VMEM-resident tile, padded to (8, 128) layout tiles."""
    s = list(shape)
    if len(s) >= 2:
        s[-2] = _round_up(s[-2], 8)
    s[-1] = _round_up(s[-1], LANE)
    n = dtype_bytes
    for d in s:
        n *= d
    return n


def _vmem_limit(footprint_bytes):
    # Footprint-derived scoped-VMEM limit: generous slack, but capped at 48 MiB
    # so it is safe on v7x (64 MiB physical per TC) as well as v5e/v6e (128 MiB).
    return int(max(8 << 20, min(48 << 20, 1.5 * footprint_bytes + (6 << 20))))


def _pick_row_tile(H, W, footprint_fn, *, row_cap, vmem_budget, min_tiles=1):
    """Largest divisor of H whose row tile fits the matmul-M and VMEM budgets."""
    divisors = [d for d in range(H, 0, -1) if H % d == 0]
    for th in divisors:
        if H // th < min_tiles and th != divisors[-1]:
            continue  # keep >= min_tiles grid steps (v7x megacore)
        if th * W <= row_cap and footprint_fn(th) <= vmem_budget:
            return th
    return divisors[-1]


# ----------------------------------------------------------------------------
# 2x bilinear upsample (align_corners=False) — fixed [0.25, 0.75] stencil.
# ----------------------------------------------------------------------------
def _upsample2x_kernel(x_ref, top_ref, bot_ref, o_ref, *, TH, W, C, C_pad):
    f32 = jnp.float32
    Cs = C + C_pad

    def _load(ref):
        v = ref[0].astype(f32)                          # (rows, W, C), f32 math
        if C_pad > 0:                                   # lane-dense storage pad
            v = jnp.concatenate(
                [v, jnp.zeros(v.shape[:-1] + (C_pad,), f32)], axis=-1)
        return v                                        # (rows, W, Cs)

    x = _load(x_ref)        # (TH, W, Cs)
    top = _load(top_ref)    # (1, W, Cs)  row above the tile (edge-replicated)
    bot = _load(bot_ref)    # (1, W, Cs)  row below the tile

    if TH > 1:
        prev_h = jnp.concatenate([top, x[:TH - 1]], axis=0)
        next_h = jnp.concatenate([x[1:], bot], axis=0)
    else:
        prev_h, next_h = top, bot
    even_h = 0.75 * x + 0.25 * prev_h                   # output rows 2j
    odd_h = 0.75 * x + 0.25 * next_h                    # output rows 2j+1

    def _wtaps(y):
        prev_w = jnp.concatenate([y[:, :1, :], y[:, :W - 1, :]], axis=1)
        next_w = jnp.concatenate([y[:, 1:, :], y[:, W - 1:, :]], axis=1)
        return 0.75 * y + 0.25 * prev_w, 0.75 * y + 0.25 * next_w

    ee, eo = _wtaps(even_h)
    oe, oo = _wtaps(odd_h)
    # channel block b*Cs + c holds output column 2k+b -> lane-dense (W, 2*Cs) rows
    row_even = jnp.concatenate([ee, eo], axis=-1)       # (TH, W, 2*Cs)
    row_odd = jnp.concatenate([oe, oo], axis=-1)
    out = jnp.stack([row_even, row_odd], axis=1)        # (TH, 2, W, 2*Cs)
    o_ref[...] = out.reshape(1, TH, 2, W, 2 * Cs).astype(o_ref.dtype)


def upsample2x_bilinear(x, c_storage):
    """x: (N, H, W, C) bf16 -> (N, 2H, 2W, c_storage) bf16 (channels zero-padded)."""
    N, H, W, C = x.shape
    C_pad = c_storage - C

    def footprint(th):
        b = 2 * _tile_bytes((th, W, C), 2)                  # x block (2 buffers)
        b += 4 * _tile_bytes((1, W, C), 2)                  # halo rows
        b += 2 * _tile_bytes((th, 2, W, 2 * c_storage), 2)  # output block
        b += 10 * _tile_bytes((th, W, c_storage), 4)        # f32 stencil temps
        return b

    TH = _pick_row_tile(H, W, footprint, row_cap=2048, vmem_budget=26 << 20,
                        min_tiles=2 if N == 1 else 1)
    n_h = H // TH

    kernel = functools.partial(_upsample2x_kernel, TH=TH, W=W, C=C, C_pad=C_pad)
    out5 = pl.pallas_call(
        kernel,
        out_shape=jax.ShapeDtypeStruct((N, H, 2, W, 2 * c_storage), x.dtype),
        grid=(N, n_h),
        in_specs=[
            pl.BlockSpec((1, TH, W, C), lambda n, h: (n, h, 0, 0)),
            pl.BlockSpec((1, 1, W, C),
                         lambda n, h: (n, jnp.maximum(h * TH - 1, 0), 0, 0)),
            pl.BlockSpec((1, 1, W, C),
                         lambda n, h: (n, jnp.minimum((h + 1) * TH, H - 1), 0, 0)),
        ],
        out_specs=pl.BlockSpec((1, TH, 2, W, 2 * c_storage),
                               lambda n, h: (n, h, 0, 0, 0)),
        compiler_params=pltpu.CompilerParams(
            dimension_semantics=("parallel", "parallel"),
            vmem_limit_bytes=_vmem_limit(footprint(TH))),
    )(x, x, x)
    # (N, H, 2, W, 2*Cs) and (N, 2H, 2W, Cs) share the row-major layout -> free reshape.
    return out5.reshape(N, 2 * H, 2 * W, c_storage)


# ----------------------------------------------------------------------------
# Fused 3x3 conv (pad=1) + folded BN + ReLU.
# ----------------------------------------------------------------------------
def _conv3x3_bn_relu_kernel(x_ref, top_ref, bot_ref, w_ref, s_ref, b_ref,
                            o_ref, big_ref, *, TH, W, Cin, TCo):
    h = pl.program_id(2)
    n_h = pl.num_programs(2)
    x = x_ref[0]                                        # (TH, W, Cin) bf16
    dt = x.dtype

    # Centre K-block of the im2col scratch = the (TH+2)-row haloed tile.
    big_ref[1:TH + 1, :, Cin:2 * Cin] = x

    @pl.when(h == 0)
    def _top_zero():                                    # global top edge: zero pad
        big_ref[0:1, :, Cin:2 * Cin] = jnp.zeros((1, W, Cin), dt)

    @pl.when(h > 0)
    def _top_halo():
        big_ref[0:1, :, Cin:2 * Cin] = top_ref[0]

    @pl.when(h == n_h - 1)
    def _bot_zero():                                    # global bottom edge
        big_ref[TH + 1:TH + 2, :, Cin:2 * Cin] = jnp.zeros((1, W, Cin), dt)

    @pl.when(h < n_h - 1)
    def _bot_halo():
        big_ref[TH + 1:TH + 2, :, Cin:2 * Cin] = bot_ref[0]

    # dx = -1 / +1 K-blocks: column-shifted copies, zero columns at the W edges.
    xh = big_ref[:, :, Cin:2 * Cin]                     # (TH+2, W, Cin)
    zero_col = jnp.zeros((TH + 2, 1, Cin), dt)
    big_ref[:, :, 0:Cin] = jnp.concatenate([zero_col, xh[:, :W - 1, :]], axis=1)
    big_ref[:, :, 2 * Cin:3 * Cin] = jnp.concatenate([xh[:, 1:, :], zero_col], axis=1)

    # 3 fat matmuls, K = 3*Cin (dx taps folded into the contraction dim).
    acc = jnp.zeros((TH * W, TCo), jnp.float32)
    for dy in range(3):
        patch = big_ref[dy:dy + TH].reshape(TH * W, 3 * Cin)
        acc = acc + jnp.dot(patch, w_ref[dy], preferred_element_type=jnp.float32)

    y = jnp.maximum(acc * s_ref[...] + b_ref[...], 0.0)   # folded BN + ReLU (f32)
    o_ref[...] = y.reshape(1, TH, W, TCo).astype(o_ref.dtype)


def conv3x3_bn_relu(x, w2, scale, bias):
    """x: (N,H,W,Cin_s) bf16 NHWC; w2: (3, 3*Cin_s, Cout_s) bf16; scale/bias: (1, Cout_s) f32."""
    N, H, W, Cin = x.shape
    Cout = w2.shape[-1]
    assert w2.shape == (3, 3 * Cin, Cout)

    # Output-channel tile: full Cout when it fits (n_co == 1 -> activation tile,
    # halos and im2col scratch built once per (n, h) tile; full MXU N width).
    if Cout <= 512:
        TCo = Cout
    elif Cout % 256 == 0:
        TCo = 256
    else:
        TCo = 128
    n_co = Cout // TCo

    def footprint(th):
        b = 2 * _tile_bytes((th, W, Cin), 2)             # x block (2 buffers)
        b += 4 * _tile_bytes((1, W, Cin), 2)             # halo rows
        b += 2 * _tile_bytes((3, 3 * Cin, TCo), 2)       # weight tile
        b += 4 * _tile_bytes((1, TCo), 4)                # scale / bias
        b += 2 * _tile_bytes((th, W, TCo), 2)            # output block
        b += _tile_bytes((th + 2, W, 3 * Cin), 2)        # im2col scratch
        b += _tile_bytes((th * W, TCo), 4)               # f32 accumulator
        b += _tile_bytes((th * W, 3 * Cin), 2)           # matmul patch temp
        return b

    TH = _pick_row_tile(H, W, footprint, row_cap=1024, vmem_budget=26 << 20,
                        min_tiles=2 if N * n_co == 1 else 1)
    n_h = H // TH

    kernel = functools.partial(_conv3x3_bn_relu_kernel,
                               TH=TH, W=W, Cin=Cin, TCo=TCo)
    return pl.pallas_call(
        kernel,
        out_shape=jax.ShapeDtypeStruct((N, H, W, Cout), jnp.bfloat16),
        grid=(N, n_co, n_h),           # h innermost -> weight tile stays resident
        in_specs=[
            pl.BlockSpec((1, TH, W, Cin), lambda n, co, h: (n, h, 0, 0)),
            pl.BlockSpec((1, 1, W, Cin),
                         lambda n, co, h: (n, jnp.maximum(h * TH - 1, 0), 0, 0)),
            pl.BlockSpec((1, 1, W, Cin),
                         lambda n, co, h: (n, jnp.minimum((h + 1) * TH, H - 1), 0, 0)),
            pl.BlockSpec((3, 3 * Cin, TCo), lambda n, co, h: (0, 0, co)),
            pl.BlockSpec((1, TCo), lambda n, co, h: (0, co)),
            pl.BlockSpec((1, TCo), lambda n, co, h: (0, co)),
        ],
        out_specs=pl.BlockSpec((1, TH, W, TCo), lambda n, co, h: (n, h, 0, co)),
        scratch_shapes=[pltpu.VMEM((TH + 2, W, 3 * Cin), x.dtype)],
        compiler_params=pltpu.CompilerParams(
            dimension_semantics=("parallel", "parallel", "parallel"),
            vmem_limit_bytes=_vmem_limit(footprint(TH))),
    )(x, x, x, w2, scale, bias)


# ----------------------------------------------------------------------------
# Parameters (synthetic, matching the PyTorch module shapes) and forward.
# ----------------------------------------------------------------------------
def _fold_bn(conv_bias, gamma, beta, running_mean, running_var, eps=1e-5):
    scale = gamma / jnp.sqrt(running_var + eps)
    bias = (conv_bias - running_mean) * scale + beta
    return scale, bias


def _prep_layer(w, scale, bias):
    """Pad channels to the lane-dense storage width, fold dx into K, cast to bf16."""
    cin, cout = w.shape[2], w.shape[3]
    cin_s, cout_s = _storage_channels(cin), _storage_channels(cout)
    w_p = jnp.zeros((3, 3, cin_s, cout_s), jnp.float32).at[:, :, :cin, :cout].set(w)
    w2 = w_p.reshape(3, 3 * cin_s, cout_s).astype(jnp.bfloat16)  # [dy, dx*Cin_s + ci, co]
    s = jnp.zeros((1, cout_s), jnp.float32).at[0, :cout].set(scale)
    b = jnp.zeros((1, cout_s), jnp.float32).at[0, :cout].set(bias)
    return {"w2": w2, "scale": s, "bias": b,
            "cin": cin, "cout": cout, "cin_s": cin_s, "cout_s": cout_s}


def init_segnet_enc_params(key, in_channels, out_channels, num_layers):
    mid = in_channels // 2
    chans = [(in_channels, mid)] + [(mid, mid)] * num_layers + [(mid, out_channels)]
    layers = []
    for cin, cout in chans:
        key, kw, kb, kg, kbeta, km, kv = jax.random.split(key, 7)
        w = jax.random.normal(kw, (3, 3, cin, cout), jnp.float32) * 0.1
        b = jax.random.normal(kb, (cout,), jnp.float32) * 0.1
        gamma = 1.0 + 0.1 * jax.random.normal(kg, (cout,), jnp.float32)
        beta = 0.1 * jax.random.normal(kbeta, (cout,), jnp.float32)
        rmean = 0.1 * jax.random.normal(km, (cout,), jnp.float32)
        rvar = jnp.abs(1.0 + 0.1 * jax.random.normal(kv, (cout,), jnp.float32))
        scale, bias = _fold_bn(b, gamma, beta, rmean, rvar)
        layers.append(_prep_layer(w, scale, bias))
    return {"layers": layers, "in_channels": in_channels, "out_channels": out_channels}


def segnet_enc_forward(x_nchw, params):
    """x_nchw: (N, Cin, H, W) float32 -> (N, Cout, 2H, 2W) float32."""
    layers = params["layers"]
    out_c = params["out_channels"]
    assert x_nchw.shape[1] == layers[0]["cin"]

    # Single fused NCHW -> NHWC + bf16 downcast pass; the lane-dense channel
    # padding happens inside the upsample kernel (no f32 pad round trip in HBM).
    # TODO(synk): fold this transpose into the upsample kernel via NCHW-blocked reads.
    x = jnp.transpose(x_nchw, (0, 2, 3, 1)).astype(jnp.bfloat16)

    x = upsample2x_bilinear(x, layers[0]["cin_s"])
    for lyr in layers:
        x = conv3x3_bn_relu(x, lyr["w2"], lyr["scale"], lyr["bias"])

    x = x[..., :out_c]                                            # drop channel padding
    return jnp.transpose(x, (0, 3, 1, 2)).astype(jnp.float32)     # NHWC -> NCHW, f32


if __name__ == "__main__":
    key = jax.random.PRNGKey(0)
    k_params, k_x = jax.random.split(key)

    in_channels, out_channels, num_layers = 4, 4, 1
    params = init_segnet_enc_params(k_params, in_channels, out_channels, num_layers)

    x = jax.random.normal(k_x, (2, in_channels, 16, 16), jnp.float32)  # NCHW

    out = jax.block_until_ready(segnet_enc_forward(x, params))
    assert out.shape == (2, out_channels, 32, 32), out.shape
    assert bool(jnp.all(out >= 0.0))  # ReLU output
    print("KERNEL_OK")
</pallas_src>

<mosaic_0001>
module attributes {stable_mosaic.version = 11 : i64} {
  func.func @_upsample2x_kernel(%arg0: i32, %arg1: i32, %arg2: memref<1x16x16x4xbf16, #tpu.memory_space<vmem>>, %arg3: memref<1x1x16x4xbf16, #tpu.memory_space<vmem>>, %arg4: memref<1x1x16x4xbf16, #tpu.memory_space<vmem>>, %arg5: memref<1x16x2x16x256xbf16, #tpu.memory_space<vmem>>) attributes {dimension_semantics = [#tpu.dimension_semantics<parallel>, #tpu.dimension_semantics<parallel>], iteration_bounds = array<i64: 2, 1>, scalar_prefetch = 0 : i64, scratch_operands = 0 : i64, tpu.core_type = #tpu.core_type<tc>, window_params = [{transform_indices = @transform_0, window_bounds = array<i64: 1, 16, 16, 4>}, {transform_indices = @transform_1, window_bounds = array<i64: 1, 1, 16, 4>}, {transform_indices = @transform_2, window_bounds = array<i64: 1, 1, 16, 4>}, {transform_indices = @transform_3, window_bounds = array<i64: 1, 16, 2, 16, 256>}]} {
    %c0 = arith.constant 0 : index
    %c0_0 = arith.constant 0 : index
    %c0_1 = arith.constant 0 : index
    %c0_2 = arith.constant 0 : index
    %0 = vector.load %arg2[%c0, %c0_0, %c0_1, %c0_2] : memref<1x16x16x4xbf16, #tpu.memory_space<vmem>>, vector<1x16x16x4xbf16>
    %1 = vector.shape_cast %0 : vector<1x16x16x4xbf16> to vector<16x16x4xbf16>
    %2 = arith.extf %1 : vector<16x16x4xbf16> to vector<16x16x4xf32>
    %cst = arith.constant 0.000000e+00 : f32
    %3 = vector.broadcast %cst : f32 to vector<16x16x124xf32>
    %4 = tpu.concatenate %2, %3 in 2 : vector<16x16x4xf32>, vector<16x16x124xf32> -> vector<16x16x128xf32>
    %c0_3 = arith.constant 0 : index
    %c0_4 = arith.constant 0 : index
    %c0_5 = arith.constant 0 : index
    %c0_6 = arith.constant 0 : index
    %5 = vector.load %arg3[%c0_3, %c0_4, %c0_5, %c0_6] : memref<1x1x16x4xbf16, #tpu.memory_space<vmem>>, vector<1x1x16x4xbf16>
    %6 = vector.shape_cast %5 : vector<1x1x16x4xbf16> to vector<1x16x4xbf16>
    %7 = arith.extf %6 : vector<1x16x4xbf16> to vector<1x16x4xf32>
    %cst_7 = arith.constant 0.000000e+00 : f32
    %8 = vector.broadcast %cst_7 : f32 to vector<1x16x124xf32>
    %9 = tpu.concatenate %7, %8 in 2 : vector<1x16x4xf32>, vector<1x16x124xf32> -> vector<1x16x128xf32>
    %c0_8 = arith.constant 0 : index
    %c0_9 = arith.constant 0 : index
    %c0_10 = arith.constant 0 : index
    %c0_11 = arith.constant 0 : index
    %10 = vector.load %arg4[%c0_8, %c0_9, %c0_10, %c0_11] : memref<1x1x16x4xbf16, #tpu.memory_space<vmem>>, vector<1x1x16x4xbf16>
    %11 = vector.shape_cast %10 : vector<1x1x16x4xbf16> to vector<1x16x4xbf16>
    %12 = arith.extf %11 : vector<1x16x4xbf16> to vector<1x16x4xf32>
    %cst_12 = arith.constant 0.000000e+00 : f32
    %13 = vector.broadcast %cst_12 : f32 to vector<1x16x124xf32>
    %14 = tpu.concatenate %12, %13 in 2 : vector<1x16x4xf32>, vector<1x16x124xf32> -> vector<1x16x128xf32>
    %15 = vector.extract_strided_slice %4 {offsets = [0, 0, 0], sizes = [15, 16, 128], strides = [1, 1, 1]} : vector<16x16x128xf32> to vector<15x16x128xf32>
    %16 = tpu.concatenate %9, %15 in 0 : vector<1x16x128xf32>, vector<15x16x128xf32> -> vector<16x16x128xf32>
    %17 = vector.extract_strided_slice %4 {offsets = [1, 0, 0], sizes = [15, 16, 128], strides = [1, 1, 1]} : vector<16x16x128xf32> to vector<15x16x128xf32>
    %18 = tpu.concatenate %17, %14 in 0 : vector<15x16x128xf32>, vector<1x16x128xf32> -> vector<16x16x128xf32>
    %cst_13 = arith.constant 7.500000e-01 : f32
    %19 = vector.broadcast %cst_13 : f32 to vector<16x16x128xf32>
    %20 = arith.mulf %19, %4 : vector<16x16x128xf32>
    %cst_14 = arith.constant 2.500000e-01 : f32
    %21 = vector.broadcast %cst_14 : f32 to vector<16x16x128xf32>
    %22 = arith.mulf %21, %16 : vector<16x16x128xf32>
    %23 = arith.addf %20, %22 : vector<16x16x128xf32>
    %cst_15 = arith.constant 7.500000e-01 : f32
    %24 = vector.broadcast %cst_15 : f32 to vector<16x16x128xf32>
    %25 = arith.mulf %24, %4 : vector<16x16x128xf32>
    %cst_16 = arith.constant 2.500000e-01 : f32
    %26 = vector.broadcast %cst_16 : f32 to vector<16x16x128xf32>
    %27 = arith.mulf %26, %18 : vector<16x16x128xf32>
    %28 = arith.addf %25, %27 : vector<16x16x128xf32>
    %29 = vector.extract_strided_slice %23 {offsets = [0, 0, 0], sizes = [16, 1, 128], strides = [1, 1, 1]} : vector<16x16x128xf32> to vector<16x1x128xf32>
    %30 = vector.extract_strided_slice %23 {offsets = [0, 0, 0], sizes = [16, 15, 128], strides = [1, 1, 1]} : vector<16x16x128xf32> to vector<16x15x128xf32>
    %31 = tpu.concatenate %29, %30 in 1 : vector<16x1x128xf32>, vector<16x15x128xf32> -> vector<16x16x128xf32>
    %32 = vector.extract_strided_slice %23 {offsets = [0, 1, 0], sizes = [16, 15, 128], strides = [1, 1, 1]} : vector<16x16x128xf32> to vector<16x15x128xf32>
    %33 = vector.extract_strided_slice %23 {offsets = [0, 15, 0], sizes = [16, 1, 128], strides = [1, 1, 1]} : vector<16x16x128xf32> to vector<16x1x128xf32>
    %34 = tpu.concatenate %32, %33 in 1 : vector<16x15x128xf32>, vector<16x1x128xf32> -> vector<16x16x128xf32>
    %cst_17 = arith.constant 7.500000e-01 : f32
    %35 = vector.broadcast %cst_17 : f32 to vector<16x16x128xf32>
    %36 = arith.mulf %35, %23 : vector<16x16x128xf32>
    %cst_18 = arith.constant 2.500000e-01 : f32
    %37 = vector.broadcast %cst_18 : f32 to vector<16x16x128xf32>
    %38 = arith.mulf %37, %31 : vector<16x16x128xf32>
    %39 = arith.addf %36, %38 : vector<16x16x128xf32>
    %cst_19 = arith.constant 7.500000e-01 : f32
    %40 = vector.broadcast %cst_19 : f32 to vector<16x16x128xf32>
    %41 = arith.mulf %40, %23 : vector<16x16x128xf32>
    %cst_20 = arith.constant 2.500000e-01 : f32
    %42 = vector.broadcast %cst_20 : f32 to vector<16x16x128xf32>
    %43 = arith.mulf %42, %34 : vector<16x16x128xf32>
    %44 = arith.addf %41, %43 : vector<16x16x128xf32>
    %45 = vector.extract_strided_slice %28 {offsets = [0, 0, 0], sizes = [16, 1, 128], strides = [1, 1, 1]} : vector<16x16x128xf32> to vector<16x1x128xf32>
    %46 = vector.extract_strided_slice %28 {offsets = [0, 0, 0], sizes = [16, 15, 128], strides = [1, 1, 1]} : vector<16x16x128xf32> to vector<16x15x128xf32>
    %47 = tpu.concatenate %45, %46 in 1 : vector<16x1x128xf32>, vector<16x15x128xf32> -> vector<16x16x128xf32>
    %48 = vector.extract_strided_slice %28 {offsets = [0, 1, 0], sizes = [16, 15, 128], strides = [1, 1, 1]} : vector<16x16x128xf32> to vector<16x15x128xf32>
    %49 = vector.extract_strided_slice %28 {offsets = [0, 15, 0], sizes = [16, 1, 128], strides = [1, 1, 1]} : vector<16x16x128xf32> to vector<16x1x128xf32>
    %50 = tpu.concatenate %48, %49 in 1 : vector<16x15x128xf32>, vector<16x1x128xf32> -> vector<16x16x128xf32>
    %cst_21 = arith.constant 7.500000e-01 : f32
    %51 = vector.broadcast %cst_21 : f32 to vector<16x16x128xf32>
    %52 = arith.mulf %51, %28 : vector<16x16x128xf32>
    %cst_22 = arith.constant 2.500000e-01 : f32
    %53 = vector.broadcast %cst_22 : f32 to vector<16x16x128xf32>
    %54 = arith.mulf %53, %47 : vector<16x16x128xf32>
    %55 = arith.addf %52, %54 : vector<16x16x128xf32>
    %cst_23 = arith.constant 7.500000e-01 : f32
    %56 = vector.broadcast %cst_23 : f32 to vector<16x16x128xf32>
    %57 = arith.mulf %56, %28 : vector<16x16x128xf32>
    %cst_24 = arith.constant 2.500000e-01 : f32
    %58 = vector.broadcast %cst_24 : f32 to vector<16x16x128xf32>
    %59 = arith.mulf %58, %50 : vector<16x16x128xf32>
    %60 = arith.addf %57, %59 : vector<16x16x128xf32>
    %61 = tpu.concatenate %39, %44 in 2 : vector<16x16x128xf32>, vector<16x16x128xf32> -> vector<16x16x256xf32>
    %62 = tpu.concatenate %55, %60 in 2 : vector<16x16x128xf32>, vector<16x16x128xf32> -> vector<16x16x256xf32>
    %63 = vector.shape_cast %61 : vector<16x16x256xf32> to vector<16x1x16x256xf32>
    %64 = vector.shape_cast %62 : vector<16x16x256xf32> to vector<16x1x16x256xf32>
    %65 = tpu.concatenate %63, %64 in 1 : vector<16x1x16x256xf32>, vector<16x1x16x256xf32> -> vector<16x2x16x256xf32>
    %66 = vector.shape_cast %65 : vector<16x2x16x256xf32> to vector<1x16x2x16x256xf32>
    %67 = arith.truncf %66 : vector<1x16x2x16x256xf32> to vector<1x16x2x16x256xbf16>
    %c0_25 = arith.constant 0 : index
    %c0_26 = arith.constant 0 : index
    %c0_27 = arith.constant 0 : index
    %c0_28 = arith.constant 0 : index
    %c0_29 = arith.constant 0 : index
    %68 = vector.load %arg5[%c0_25, %c0_26, %c0_27, %c0_28, %c0_29] : memref<1x16x2x16x256xbf16, #tpu.memory_space<vmem>>, vector<1x16x2x16x256xbf16>
    tpu.vector_store %arg5[%c0_25, %c0_26, %c0_27, %c0_28, %c0_29], %67 {strides = array<i32>} : memref<1x16x2x16x256xbf16, #tpu.memory_space<vmem>>, vector<1x16x2x16x256xbf16>,
    return
  }
  func.func @transform_0(%arg0: i32, %arg1: i32) -> (i32, i32, i32, i32) {
    %c0_i32 = arith.constant 0 : i32
    %c0_i32_0 = arith.constant 0 : i32
    %c0_i32_1 = arith.constant 0 : i32
    return %arg0, %arg1, %c0_i32, %c0_i32_0 : i32, i32, i32, i32
  }
  func.func @transform_1(%arg0: i32, %arg1: i32) -> (i32, i32, i32, i32) {
    %c16_i32 = arith.constant 16 : i32
    %0 = arith.muli %arg1, %c16_i32 : i32
    %c1_i32 = arith.constant 1 : i32
    %1 = arith.subi %0, %c1_i32 : i32
    %c0_i32 = arith.constant 0 : i32
    %2 = arith.maxsi %1, %c0_i32 : i32
    %c0_i32_0 = arith.constant 0 : i32
    %c0_i32_1 = arith.constant 0 : i32
    %c0_i32_2 = arith.constant 0 : i32
    return %arg0, %2, %c0_i32_0, %c0_i32_1 : i32, i32, i32, i32
  }
  func.func @transform_2(%arg0: i32, %arg1: i32) -> (i32, i32, i32, i32) {
    %c1_i32 = arith.constant 1 : i32
    %0 = arith.addi %arg1, %c1_i32 : i32
    %c16_i32 = arith.constant 16 : i32
    %1 = arith.muli %0, %c16_i32 : i32
    %c15_i32 = arith.constant 15 : i32
    %2 = arith.minsi %1, %c15_i32 : i32
    %c0_i32 = arith.constant 0 : i32
    %c0_i32_0 = arith.constant 0 : i32
    %c0_i32_1 = arith.constant 0 : i32
    return %arg0, %2, %c0_i32, %c0_i32_0 : i32, i32, i32, i32
  }
  func.func @transform_3(%arg0: i32, %arg1: i32) -> (i32, i32, i32, i32, i32) {
    %c0_i32 = arith.constant 0 : i32
    %c0_i32_0 = arith.constant 0 : i32
    %c0_i32_1 = arith.constant 0 : i32
    %c0_i32_2 = arith.constant 0 : i32
    return %arg0, %arg1, %c0_i32, %c0_i32_0, %c0_i32_1 : i32, i32, i32, i32, i32
  }
}

</mosaic_0001>

<bundles_post_ra>
// kernel: tpu_custom_call.1
= control target key start
LH: loop header
LB: loop body
LE: loop exit
PB: predicated region body
PF: predicated region fallthrough
CT: control target
= control target key end

     0   :  { %8 = vsyncpa [#allocation3], 0  ;;  %s2433_s0 = inlined_call_operand.vmem [shape: bf16[2,16,16,4], index: 0, kind: input, shape index: {}]   ;;  %s2434_s1 = inlined_call_operand.vmem [shape: bf16[2,16,16,4], index: 1, kind: input, shape index: {}]   ;;  %s2435_s2 = inlined_call_operand.vmem [shape: bf16[2,16,16,4], index: 2, kind: input, shape index: {}]   ;;  %s2436_s3 = inlined_call_operand.hbm [shape: bf16[2,16,2,16,256], index: 3, kind: output, shape index: {}]  }
   0x1   :  { %10 = vsyncpa [#allocation3 + $0x1], 0  ;;  %s1878_s12 = smov 0   ;;  %s1880_s13 = smov 0  }
   0x2   :  { %s1882_s14 = smov 0   ;;  %s1884_s15 = smov 0  }
   0x3   :  { %s1886_s16 = smov 0   ;;  %s1888_s17 = smov 0  }
   0x4 LB: > { %s1609_s18 = sadd.s32 4294967295, %s1854_s17   ;;  %s1610_s19 = sadd.s32 4294967294, %s1854_s17   ;;  %s1854_s17 = sphi %s1888_s17, %s16_s17   ;;  %s1850_s16 = sphi %s1886_s16, %s2443_s16   ;;  %s1846_s15 = sphi %s1884_s15, %s2442_s15   ;;  %s1842_s14 = sphi %s1882_s14, %s2441_s14   ;;  %s1838_s13 = sphi %s1880_s13, %s2440_s13   ;;  %s1834_s12 = sphi %s1878_s12, %s2439_s12  }
   0x5   : > { %s28_s20 = sadd.s32 1, %s1850_s16  ;;  %s137_s21 = sadd.s32 1, %s1842_s14 }
   0x6   : > { %p30_p0 = scmp.ge.s32.totalorder %s28_s20, 2  ;;  %p147_p1 = scmp.ne.s32.totalorder %s1842_s14, %s1838_s13 }
   0x7   : > { %p148_p2 = scmp.eq.s32.totalorder %s1609_s18, 1  ;;  %p153_p3 = scmp.ne.s32.totalorder %s1838_s13, %s1834_s12 }
   0x8   : > { %s2445_s20 = smov (%p30_p0, %s28_s20), 0  ;;  %p154_p5 = scmp.eq.s32.totalorder %s1610_s19, 1 }
   0x9   : > { %p1918_p4 = por %p148_p2, %p147_p1  ;;  %s132_s23 = ssub.s32 %s1850_s16, %s2445_s20 }
   0xa   : > { %p1613_p6 = scmp.ge.s32.totalorder %s1854_s17, 1  ;;  %p135_p7 = scmp.eq.s32.totalorder %s132_s23, 0 }
   0xb   : > { %p1925_p8 = por %p154_p5, %p153_p3  ;;  %p226_p9 = scmp.lt.s32.totalorder %s1854_s17, 3 }
   0xc   : > { %s1931_s25 = scalar_select %p135_p7, %s1842_s14, %s137_s21  }
   0xd   : > { %p227_p10 = pnand %p1613_p6, %p226_p9 }
   0xe   : > { %p282_p11 = scmp.lt.s32.totalorder (!%p227_p10), %s1846_s15, 1  ;;  %s278_s7 = sand.u32 (!%p227_p10), 1, %s1838_s13  }
   0xf   : > { %230 = sbr.rel (%p227_p10) target bundleno = 247 (0xf7), region = 32  ;;  %s1614_s8 = sshll.u32 (!%p227_p10), %s278_s7, 9 }
  0x10   : > { %s1984_s9 = scalar_lea.vmem (!%p227_p10), [#allocation2], %s1614_s8  ;;  %s1630_s21 = sshll.u32 (!%p227_p10), %s1846_s15, 9 }
  0x11   : > { %s1467_s29 = scalar_lea.sflag (!%p227_p10), [#allocation3], %s278_s7  ;;  %s1796_s8 = scalar_lea.hbm (!%p227_p10), %s2436_s3, 1024 }
  0x14   : > { %s283_s26 = scalar_select %p282_p11, %s1846_s15, 1  ;;  %vm391_vm0 = vcmask 31744   ;;  %vm600_vm1 = vcmask 1040384   ;;  %vm697_vm2 = vcmask 1046528  }
  0x15   : > { %s1482_s15 = sshll.u32 %s1984_s9, 4  ;;  %s1483_s15 = int_to_ptr.vmem [resolvable:$true] %s1482_s15 }
  0x16   : > { %s1935_s27 = sshll.u32 %s283_s26, 7 }
  0x17   : > { %s1941_s30 = scalar_lea.vmem %s2433_s0, %s1935_s27  ;;  %s304_s6 = scalar_lea.vmem %s2434_s1, %s1935_s27 }
  0x18   : > { %v1632_v0 = vld [vmem:[%s1941_s30] sm:$0xff]   ;;  %v1704_v2 = vld [vmem:[%s1941_s30 + $0x8] sm:$0xff]   ;;  %v1705_v7 = vld [vmem:[%s1941_s30 + $0x10] sm:$0xff]   ;;  %s1629_s10 = sadd.s32 120, %s1935_s27  ;;  %s1481_s27 = scalar_lea.hbm %s2436_s3, %s1630_s21 }
  0x19   : > { %v1696_v1 = vld [vmem:[%s304_s6] sm:$0xff]   ;;  %v1633_v3 = vunpack.c.l.bf16 %v1632_v0  ;;  %v1634_v4 = vunpack.c.h.bf16 %v1632_v0  ;;  %v1637_v8 = vunpack.c.l.bf16 %v1704_v2  ;;  %v1638_v9 = vunpack.c.h.bf16 %v1704_v2  ;;  %s321_s19 = scalar_lea.vmem %s2435_s2, %s1629_s10  ;;  %s1484_s28 = sshll.u32 %s1481_s27, 4  ;;  %s1485_s28 = int_to_ptr.hbm [resolvable:$true] %s1484_s28 }
  0x1a   : > { %v1697_v5 = vunpack.c.l.bf16 %v1696_v1  ;;  %v1698_v6 = vunpack.c.h.bf16 %v1696_v1  ;;  %v1641_v10 = vunpack.c.l.bf16 %v1705_v7  ;;  %v1642_v11 = vunpack.c.h.bf16 %v1705_v7 }
  0x1b   : > { %v392_v12 = vsel %vm391_vm0, %v1633_v3, 0.0  ;;  %v393_v13 = vsel %vm391_vm0, %v1634_v4, 0.0  ;;  %v394_v20 = vsel %vm391_vm0, %v1637_v8, 0.0  ;;  %v395_v21 = vsel %vm391_vm0, %v1638_v9, 0.0 }
  0x1c   : > { %v428_v14 = vsel %vm391_vm0, %v1697_v5, 0.0  ;;  %v429_v15 = vsel %vm391_vm0, %v1698_v6, 0.0  ;;  %v436_v16 = vmul.f32 0.75, %v392_v12  ;;  %v437_v17 = vmul.f32 0.75, %v393_v13 }
  0x1d   : > { %v468_v18 = vmul.f32 0.25, %v428_v14  ;;  %v469_v19 = vmul.f32 0.25, %v429_v15  ;;  %v470_v22 = vmul.f32 0.25, %v392_v12  ;;  %v471_v23 = vmul.f32 0.25, %v393_v13 }
  0x1e   : > { %v1956_v26 = vmul.f32 0.25, %v394_v20  ;;  %v1958_v27 = vmul.f32 0.25, %v395_v21  ;;  %v1960_v28 = vmul.f32 0.75, %v394_v20  ;;  %v1962_v29 = vmul.f32 0.75, %v395_v21 }
  0x1f   : > { %v500_v24 = vadd.f32 %v468_v18, %v436_v16  ;;  %v501_v25 = vadd.f32 %v469_v19, %v437_v17  ;;  %v1965_v30 = vsel %vm391_vm0, %v1641_v10, 0.0  ;;  %v1968_v31 = vsel %vm391_vm0, %v1642_v11, 0.0 }
  0x20   : > { %v536_v38 = vadd.f32 %v1956_v26, %v436_v16  ;;  %v537_v39 = vadd.f32 %v1958_v27, %v437_v17  ;;  %v502_v43 = vadd.f32 %v470_v22, %v1960_v28  ;;  %v503_v7 = vadd.f32 %v471_v23, %v1962_v29 }
  0x21   : > { %v601_v32 = vrot.slane %v500_v24, 7  ;;  %v698_v33 = vrot.slane %v500_v24, 1  ;;  %v699_v34 = vrot.slane %v501_v25, 1  ;;  %v794_v35 = vmul.f32 0.75, %v500_v24 }
  0x22   : > { %v602_v36 = vrot.slane %v501_v25, 7  ;;  %v795_v37 = vmul.f32 0.75, %v501_v25  ;;  %v986_v49 = vrot.slane %v536_v38, 7  ;;  %v1082_v50 = vrot.slane %v536_v38, 1 }
  0x23   : > { %v681_v40 = vsel %vm600_vm1, %v500_v24, %v601_v32  ;;  %v700_v41 = vsel %vm697_vm2, %v698_v33, %v699_v34  ;;  %v778_v42 = vsel %vm697_vm2, %v699_v34, %v501_v25  ;;  %v1083_v51 = vrot.slane %v537_v39, 1 }
  0x24   : > { %v826_v44 = vmul.f32 0.25, %v681_v40  ;;  %v890_v45 = vmul.f32 0.25, %v700_v41  ;;  %v603_v46 = vsel %vm600_vm1, %v601_v32, %v602_v36  ;;  %v891_v47 = vmul.f32 0.25, %v778_v42 }
  0x25   : > { %v827_v48 = vmul.f32 0.25, %v603_v46  ;;  %v1178_v55 = vmul.f32 0.75, %v536_v38  ;;  %v1066_v57 = vsel %vm600_vm1, %v536_v38, %v986_v49  ;;  %v1084_v58 = vsel %vm697_vm2, %v1082_v50, %v1083_v51 }
  0x26   : > { %v858_v52 = vadd.f32 %v826_v44, %v794_v35  ;;  %v922_v53 = vadd.f32 %v890_v45, %v794_v35  ;;  %v923_v54 = vadd.f32 %v891_v47, %v795_v37  ;;  %v987_v59 = vrot.slane %v537_v39, 7 }
  0x27   : > { %v859_v56 = vadd.f32 %v827_v48, %v795_v37  ;;  %v1210_v61 = vmul.f32 0.25, %v1066_v57  ;;  %v1274_v62 = vmul.f32 0.25, %v1084_v58  ;;  %v1162_v63 = vsel %vm697_vm2, %v1083_v51, %v537_v39 }
  0x28   : > { %v1338_v60 = vpack.c.bf16 %v922_v53, %v858_v52  ;;  %v988_v1 = vsel %vm600_vm1, %v986_v49, %v987_v59  ;;  %v1179_v2 = vmul.f32 0.75, %v537_v39  ;;  %v1275_v3 = vmul.f32 0.25, %v1162_v63  ;;  %v1706_v49 = vld [vmem:[%s1941_s30 + $0x18] sm:$0xff]  }
  0x29   : > { %v1339_v0 = vpack.c.bf16 %v923_v54, %v859_v56  ;;  %v1242_v4 = vadd.f32 %v1210_v61, %v1178_v55  ;;  %v1306_v5 = vadd.f32 %v1274_v62, %v1178_v55  ;;  %v1211_v6 = vmul.f32 0.25, %v988_v1 }
  0x2a   : > { %1402 = vst [vmem:[%s1984_s9] sm:$0xff] %v1338_v60  ;;  %v1307_v8 = vadd.f32 %v1275_v3, %v1179_v2  ;;  %v604_v9 = vrot.slane %v502_v43, 7  ;;  %v701_v10 = vrot.slane %v502_v43, 1  ;;  %v796_v11 = vmul.f32 0.75, %v502_v43 }
  0x2b   : > { %1403 = vst [vmem:[%s1984_s9 + $0x8] sm:$0xff] %v1339_v0  ;;  %v1340_v12 = vpack.c.bf16 %v1306_v5, %v1242_v4  ;;  %v1243_v13 = vadd.f32 %v1211_v6, %v1179_v2  ;;  %v702_v14 = vrot.slane %v503_v7, 1  ;;  %v605_v15 = vrot.slane %v503_v7, 7 }
  0x2c   : > { %v682_v16 = vsel %vm600_vm1, %v502_v43, %v604_v9  ;;  %v797_v17 = vmul.f32 0.75, %v503_v7  ;;  %v1991_v18 = vmul.f32 0.25, %v1965_v30  ;;  %v1994_v19 = vmul.f32 0.25, %v1968_v31 }
  0x2d   : > { %1404 = vst [vmem:[%s1984_s9 + $0x10] sm:$0xff] %v1340_v12  ;;  %v1341_v20 = vpack.c.bf16 %v1307_v8, %v1243_v13  ;;  %v703_v21 = vsel %vm697_vm2, %v701_v10, %v702_v14  ;;  %v828_v22 = vmul.f32 0.25, %v682_v16  ;;  %v606_v23 = vsel %vm600_vm1, %v604_v9, %v605_v15  ;;  %v1707_v13 = vld [vmem:[%s1941_s30 + $0x20] sm:$0xff]  }
  0x2e   : > { %v892_v24 = vmul.f32 0.25, %v703_v21  ;;  %v779_v25 = vsel %vm697_vm2, %v702_v14, %v503_v7  ;;  %v829_v32 = vmul.f32 0.25, %v606_v23  ;;  %v538_v33 = vadd.f32 %v1991_v18, %v1960_v28 }
  0x2f   : > { %1405 = vst [vmem:[%s1984_s9 + $0x18] sm:$0xff] %v1341_v20  ;;  %v860_v34 = vadd.f32 %v828_v22, %v796_v11  ;;  %v893_v35 = vmul.f32 0.25, %v779_v25  ;;  %v539_v36 = vadd.f32 %v1994_v19, %v1962_v29  ;;  %v440_v37 = vmul.f32 0.75, %v1965_v30 }
  0x30   : > { %v924_v38 = vadd.f32 %v892_v24, %v796_v11  ;;  %v861_v39 = vadd.f32 %v829_v32, %v797_v17  ;;  %v989_v40 = vrot.slane %v538_v33, 7  ;;  %v1085_v41 = vrot.slane %v538_v33, 1 }
  0x31   : > { %v925_v42 = vadd.f32 %v893_v35, %v797_v17  ;;  %v1086_v43 = vrot.slane %v539_v36, 1  ;;  %v1180_v44 = vmul.f32 0.75, %v538_v33  ;;  %v990_v45 = vrot.slane %v539_v36, 7 }
  0x32   : > { %v1342_v28 = vpack.c.bf16 %v924_v38, %v860_v34  ;;  %v1067_v46 = vsel %vm600_vm1, %v538_v33, %v989_v40  ;;  %v1181_v47 = vmul.f32 0.75, %v539_v36  ;;  %v441_v48 = vmul.f32 0.75, %v1968_v31 }
  0x33   : > { %v1343_v29 = vpack.c.bf16 %v925_v42, %v861_v39  ;;  %v1087_v30 = vsel %vm697_vm2, %v1085_v41, %v1086_v43  ;;  %v1212_v50 = vmul.f32 0.25, %v1067_v46  ;;  %v991_v51 = vsel %vm600_vm1, %v989_v40, %v990_v45 }
  0x34   : > { %1406 = vst [vmem:[%s1984_s9 + $0x20] sm:$0xff] %v1342_v28  ;;  %v1276_v52 = vmul.f32 0.25, %v1087_v30  ;;  %v1163_v53 = vsel %vm697_vm2, %v1086_v43, %v539_v36  ;;  %v1213_v54 = vmul.f32 0.25, %v991_v51  ;;  %v504_v55 = vadd.f32 %v1956_v26, %v440_v37 }
  0x35   : > { %1407 = vst [vmem:[%s1984_s9 + $0x28] sm:$0xff] %v1343_v29  ;;  %v1244_v56 = vadd.f32 %v1212_v50, %v1180_v44  ;;  %v1277_v57 = vmul.f32 0.25, %v1163_v53  ;;  %v505_v58 = vadd.f32 %v1958_v27, %v441_v48  ;;  %v1645_v31 = vunpack.c.l.bf16 %v1706_v49 }
  0x36   : > { %v1308_v59 = vadd.f32 %v1276_v52, %v1180_v44  ;;  %v1245_v60 = vadd.f32 %v1213_v54, %v1181_v47  ;;  %v607_v61 = vrot.slane %v504_v55, 7  ;;  %v704_v62 = vrot.slane %v504_v55, 1 }
  0x37   : > { %v1309_v63 = vadd.f32 %v1277_v57, %v1181_v47  ;;  %v705_v0 = vrot.slane %v505_v58, 1  ;;  %v798_v1 = vmul.f32 0.75, %v504_v55  ;;  %v608_v2 = vrot.slane %v505_v58, 7 }
  0x38   : > { %v1344_v3 = vpack.c.bf16 %v1308_v59, %v1244_v56  ;;  %v683_v26 = vsel %vm600_vm1, %v504_v55, %v607_v61  ;;  %v799_v4 = vmul.f32 0.75, %v505_v58  ;;  %v1646_v5 = vunpack.c.h.bf16 %v1706_v49 }
  0x39   : > { %v1345_v6 = vpack.c.bf16 %v1309_v63, %v1245_v60  ;;  %v706_v27 = vsel %vm697_vm2, %v704_v62, %v705_v0  ;;  %v830_v7 = vmul.f32 0.25, %v683_v26  ;;  %v609_v8 = vsel %vm600_vm1, %v607_v61, %v608_v2  ;;  %v1708_v60 = vld [vmem:[%s1941_s30 + $0x28] sm:$0xff]  }
  0x3a   : > { %1408 = vst [vmem:[%s1984_s9 + $0x30] sm:$0xff] %v1344_v3  ;;  %v894_v9 = vmul.f32 0.25, %v706_v27  ;;  %v780_v10 = vsel %vm697_vm2, %v705_v0, %v505_v58  ;;  %v831_v11 = vmul.f32 0.25, %v609_v8  ;;  %v398_v12 = vsel %vm391_vm0, %v1645_v31, 0.0 }
  0x3b   : > { %1409 = vst [vmem:[%s1984_s9 + $0x38] sm:$0xff] %v1345_v6  ;;  %v862_v14 = vadd.f32 %v830_v7, %v798_v1  ;;  %v895_v15 = vmul.f32 0.25, %v780_v10  ;;  %v399_v16 = vsel %vm391_vm0, %v1646_v5, 0.0  ;;  %v2025_v17 = vmul.f32 0.25, %v398_v12 }
  0x3c   : > { %v926_v20 = vadd.f32 %v894_v9, %v798_v1  ;;  %v863_v21 = vadd.f32 %v831_v11, %v799_v4  ;;  %v2027_v22 = vmul.f32 0.25, %v399_v16  ;;  %v2029_v23 = vmul.f32 0.75, %v398_v12 }
  0x3d   : > { %v927_v24 = vadd.f32 %v895_v15, %v799_v4  ;;  %v540_v25 = vadd.f32 %v2025_v17, %v440_v37  ;;  %v443_v32 = vmul.f32 0.75, %v399_v16  ;;  %v1649_v33 = vunpack.c.l.bf16 %v1707_v13 }
  0x3e   : > { %v1346_v34 = vpack.c.bf16 %v926_v20, %v862_v14  ;;  %v541_v35 = vadd.f32 %v2027_v22, %v441_v48  ;;  %v506_v36 = vadd.f32 %v1991_v18, %v2029_v23  ;;  %v1650_v38 = vunpack.c.h.bf16 %v1707_v13 }
  0x3f   : > { %v1347_v39 = vpack.c.bf16 %v927_v24, %v863_v21  ;;  %v992_v40 = vrot.slane %v540_v25, 7  ;;  %v1088_v41 = vrot.slane %v540_v25, 1  ;;  %v1182_v42 = vmul.f32 0.75, %v540_v25 }
  0x40   : > { %1410 = vst [vmem:[%s1984_s9 + $0x40] sm:$0xff] %v1346_v34  ;;  %v1089_v43 = vrot.slane %v541_v35, 1  ;;  %v993_v44 = vrot.slane %v541_v35, 7  ;;  %v1183_v45 = vmul.f32 0.75, %v541_v35  ;;  %v507_v37 = vadd.f32 %v1994_v19, %v443_v32 }
  0x41   : > { %1411 = vst [vmem:[%s1984_s9 + $0x48] sm:$0xff] %v1347_v39  ;;  %v1068_v28 = vsel %vm600_vm1, %v540_v25, %v992_v40  ;;  %v610_v46 = vrot.slane %v506_v36, 7  ;;  %v707_v47 = vrot.slane %v506_v36, 1  ;;  %v800_v48 = vmul.f32 0.75, %v506_v36 }
  0x42   : > { %v1090_v49 = vsel %vm697_vm2, %v1088_v41, %v1089_v43  ;;  %v1214_v18 = vmul.f32 0.25, %v1068_v28  ;;  %v994_v29 = vsel %vm600_vm1, %v992_v40, %v993_v44  ;;  %v1164_v30 = vsel %vm697_vm2, %v1089_v43, %v541_v35 }
  0x43   : > { %v1278_v50 = vmul.f32 0.25, %v1090_v49  ;;  %v1215_v51 = vmul.f32 0.25, %v994_v29  ;;  %v1279_v52 = vmul.f32 0.25, %v1164_v30  ;;  %v684_v53 = vsel %vm600_vm1, %v506_v36, %v610_v46 }
  0x44   : > { %v1246_v19 = vadd.f32 %v1214_v18, %v1182_v42  ;;  %v708_v54 = vrot.slane %v507_v37, 1  ;;  %v832_v55 = vmul.f32 0.25, %v684_v53  ;;  %v611_v56 = vrot.slane %v507_v37, 7 }
  0x45   : > { %v1310_v57 = vadd.f32 %v1278_v50, %v1182_v42  ;;  %v1247_v58 = vadd.f32 %v1215_v51, %v1183_v45  ;;  %v1311_v31 = vadd.f32 %v1279_v52, %v1183_v45  ;;  %v801_v59 = vmul.f32 0.75, %v507_v37 }
  0x46   : > { %v709_v61 = vsel %vm697_vm2, %v707_v47, %v708_v54  ;;  %v864_v62 = vadd.f32 %v832_v55, %v800_v48  ;;  %v612_v63 = vsel %vm600_vm1, %v610_v46, %v611_v56  ;;  %v781_v0 = vsel %vm697_vm2, %v708_v54, %v507_v37 }
  0x47   : > { %v1348_v1 = vpack.c.bf16 %v1310_v57, %v1246_v19  ;;  %v1349_v2 = vpack.c.bf16 %v1311_v31, %v1247_v58  ;;  %v896_v3 = vmul.f32 0.25, %v709_v61  ;;  %v833_v26 = vmul.f32 0.25, %v612_v63  ;;  %v1709_v58 = vld [vmem:[%s1941_s30 + $0x30] sm:$0xff]  }
  0x48   : > { %v897_v4 = vmul.f32 0.25, %v781_v0  ;;  %v400_v5 = vsel %vm391_vm0, %v1649_v33, 0.0  ;;  %v401_v6 = vsel %vm391_vm0, %v1650_v38, 0.0  ;;  %v1653_v27 = vunpack.c.l.bf16 %v1708_v60 }
  0x49   : > { %1412 = vst [vmem:[%s1984_s9 + $0x50] sm:$0xff] %v1348_v1  ;;  %v928_v7 = vadd.f32 %v896_v3, %v800_v48  ;;  %v865_v8 = vadd.f32 %v833_v26, %v801_v59  ;;  %v2050_v9 = vmul.f32 0.25, %v400_v5  ;;  %v2052_v10 = vmul.f32 0.25, %v401_v6 }
  0x4a   : > { %1413 = vst [vmem:[%s1984_s9 + $0x58] sm:$0xff] %v1349_v2  ;;  %v929_v11 = vadd.f32 %v897_v4, %v801_v59  ;;  %v444_v12 = vmul.f32 0.75, %v400_v5  ;;  %v445_v13 = vmul.f32 0.75, %v401_v6  ;;  %v1654_v14 = vunpack.c.h.bf16 %v1708_v60 }
  0x4b   : > { %v1350_v15 = vpack.c.bf16 %v928_v7, %v864_v62  ;;  %v542_v16 = vadd.f32 %v2050_v9, %v2029_v23  ;;  %v543_v20 = vadd.f32 %v2052_v10, %v443_v32  ;;  %v402_v21 = vsel %vm391_vm0, %v1653_v27, 0.0 }
  0x4c   : > { %v1351_v24 = vpack.c.bf16 %v929_v11, %v865_v8  ;;  %v508_v25 = vadd.f32 %v2025_v17, %v444_v12  ;;  %v509_v33 = vadd.f32 %v2027_v22, %v445_v13  ;;  %v403_v34 = vsel %vm391_vm0, %v1654_v14, 0.0 }
  0x4d   : > { %1414 = vst [vmem:[%s1984_s9 + $0x60] sm:$0xff] %v1350_v15  ;;  %v995_v35 = vrot.slane %v542_v16, 7  ;;  %v1091_v36 = vrot.slane %v542_v16, 1  ;;  %v1092_v38 = vrot.slane %v543_v20, 1  ;;  %v1184_v39 = vmul.f32 0.75, %v542_v16 }
  0x4e   : > { %1415 = vst [vmem:[%s1984_s9 + $0x68] sm:$0xff] %v1351_v24  ;;  %v996_v40 = vrot.slane %v543_v20, 7  ;;  %v1185_v41 = vmul.f32 0.75, %v543_v20  ;;  %v613_v23 = vrot.slane %v508_v25, 7  ;;  %v710_v42 = vrot.slane %v508_v25, 1 }
  0x4f   : > { %v1069_v32 = vsel %vm600_vm1, %v542_v16, %v995_v35  ;;  %v1093_v43 = vsel %vm697_vm2, %v1091_v36, %v1092_v38  ;;  %v1165_v17 = vsel %vm697_vm2, %v1092_v38, %v543_v20  ;;  %v711_v44 = vrot.slane %v509_v33, 1 }
  0x50   : > { %v1216_v22 = vmul.f32 0.25, %v1069_v32  ;;  %v1280_v45 = vmul.f32 0.25, %v1093_v43  ;;  %v997_v37 = vsel %vm600_vm1, %v995_v35, %v996_v40  ;;  %v1281_v28 = vmul.f32 0.25, %v1165_v17 }
  0x51   : > { %v1217_v46 = vmul.f32 0.25, %v997_v37  ;;  %v685_v47 = vsel %vm600_vm1, %v508_v25, %v613_v23  ;;  %v712_v48 = vsel %vm697_vm2, %v710_v42, %v711_v44  ;;  %v802_v49 = vmul.f32 0.75, %v508_v25 }
  0x52   : > { %v1248_v18 = vadd.f32 %v1216_v22, %v1184_v39  ;;  %v1312_v29 = vadd.f32 %v1280_v45, %v1184_v39  ;;  %v1313_v30 = vadd.f32 %v1281_v28, %v1185_v41  ;;  %v834_v50 = vmul.f32 0.25, %v685_v47  ;;  %v1710_v45 = vld [vmem:[%s1941_s30 + $0x38] sm:$0xff]  }
  0x53   : > { %v1249_v51 = vadd.f32 %v1217_v46, %v1185_v41  ;;  %v898_v52 = vmul.f32 0.25, %v712_v48  ;;  %v614_v53 = vrot.slane %v509_v33, 7  ;;  %v782_v19 = vsel %vm697_vm2, %v711_v44, %v509_v33 }
  0x54   : > { %v1352_v54 = vpack.c.bf16 %v1312_v29, %v1248_v18  ;;  %v866_v55 = vadd.f32 %v834_v50, %v802_v49  ;;  %v803_v56 = vmul.f32 0.75, %v509_v33  ;;  %v899_v57 = vmul.f32 0.25, %v782_v19 }
  0x55   : > { %v1353_v31 = vpack.c.bf16 %v1313_v30, %v1249_v51  ;;  %v930_v59 = vadd.f32 %v898_v52, %v802_v49  ;;  %v615_v60 = vsel %vm600_vm1, %v613_v23, %v614_v53  ;;  %v2073_v61 = vmul.f32 0.25, %v402_v21  ;;  %v2103_v53 = vld [vmem:[%s1941_s30 + $0x40] sm:$0xff]  }
  0x56   : > { %1416 = vst [vmem:[%s1984_s9 + $0x70] sm:$0xff] %v1352_v54  ;;  %v835_v62 = vmul.f32 0.25, %v615_v60  ;;  %v931_v63 = vadd.f32 %v899_v57, %v803_v56  ;;  %v2076_v0 = vmul.f32 0.25, %v403_v34  ;;  %v2078_v1 = vmul.f32 0.75, %v402_v21 }
  0x57   : > { %1417 = vst [vmem:[%s1984_s9 + $0x78] sm:$0xff] %v1353_v31  ;;  %v1354_v2 = vpack.c.bf16 %v930_v59, %v866_v55  ;;  %v544_v3 = vadd.f32 %v2073_v61, %v444_v12  ;;  %v2082_v26 = vmul.f32 0.75, %v403_v34  ;;  %v1657_v4 = vunpack.c.l.bf16 %v1709_v58 }
  0x58   : > { %v867_v5 = vadd.f32 %v835_v62, %v803_v56  ;;  %v545_v6 = vadd.f32 %v2076_v0, %v445_v13  ;;  %v510_v27 = vadd.f32 %v2050_v9, %v2078_v1  ;;  %v1658_v7 = vunpack.c.h.bf16 %v1709_v58 }
  0x59   : > { %1418 = vst [vmem:[%s1984_s9 + $0x80] sm:$0xff] %v1354_v2  ;;  %v998_v8 = vrot.slane %v544_v3, 7  ;;  %v1094_v11 = vrot.slane %v544_v3, 1  ;;  %v1186_v14 = vmul.f32 0.75, %v544_v3  ;;  %v511_v15 = vadd.f32 %v2052_v10, %v2082_v26 }
  0x5a   : > { %v1355_v16 = vpack.c.bf16 %v931_v63, %v867_v5  ;;  %v1095_v12 = vrot.slane %v545_v6, 1  ;;  %v999_v20 = vrot.slane %v545_v6, 7  ;;  %v1187_v21 = vmul.f32 0.75, %v545_v6 }
  0x5b   : > { %v1070_v24 = vsel %vm600_vm1, %v544_v3, %v998_v8  ;;  %v616_v25 = vrot.slane %v510_v27, 7  ;;  %v713_v13 = vrot.slane %v510_v27, 1  ;;  %v714_v33 = vrot.slane %v511_v15, 1 }
  0x5c   : > { %1419 = vst [vmem:[%s1984_s9 + $0x88] sm:$0xff] %v1355_v16  ;;  %v1096_v9 = vsel %vm697_vm2, %v1094_v11, %v1095_v12  ;;  %v1218_v34 = vmul.f32 0.25, %v1070_v24  ;;  %v1000_v35 = vsel %vm600_vm1, %v998_v8, %v999_v20  ;;  %v1166_v36 = vsel %vm697_vm2, %v1095_v12, %v545_v6 }
  0x5d   : > { %v1282_v38 = vmul.f32 0.25, %v1096_v9  ;;  %v1219_v10 = vmul.f32 0.25, %v1000_v35  ;;  %v1283_v39 = vmul.f32 0.25, %v1166_v36  ;;  %v686_v40 = vsel %vm600_vm1, %v510_v27, %v616_v25 }
  0x5e   : > { %v1250_v41 = vadd.f32 %v1218_v34, %v1186_v14  ;;  %v715_v23 = vsel %vm697_vm2, %v713_v13, %v714_v33  ;;  %v804_v42 = vmul.f32 0.75, %v510_v27  ;;  %v836_v32 = vmul.f32 0.25, %v686_v40 }
  0x5f   : > { %v1314_v43 = vadd.f32 %v1282_v38, %v1186_v14  ;;  %v1251_v17 = vadd.f32 %v1219_v10, %v1187_v21  ;;  %v1315_v44 = vadd.f32 %v1283_v39, %v1187_v21  ;;  %v900_v22 = vmul.f32 0.25, %v715_v23 }
  0x60   : > { %v868_v37 = vadd.f32 %v836_v32, %v804_v42  ;;  %v617_v28 = vrot.slane %v511_v15, 7  ;;  %v783_v46 = vsel %vm697_vm2, %v714_v33, %v511_v15  ;;  %v805_v47 = vmul.f32 0.75, %v511_v15 }
  0x61   : > { %v1356_v48 = vpack.c.bf16 %v1314_v43, %v1250_v41  ;;  %v1357_v49 = vpack.c.bf16 %v1315_v44, %v1251_v17  ;;  %v932_v18 = vadd.f32 %v900_v22, %v804_v42  ;;  %v901_v29 = vmul.f32 0.25, %v783_v46 }
  0x62   : > { %v618_v30 = vsel %vm600_vm1, %v616_v25, %v617_v28  ;;  %v404_v50 = vsel %vm391_vm0, %v1657_v4, 0.0  ;;  %v405_v51 = vsel %vm391_vm0, %v1658_v7, 0.0  ;;  %v1661_v52 = vunpack.c.l.bf16 %v1710_v45 }
  0x63   : > { %1420 = vst [vmem:[%s1984_s9 + $0x90] sm:$0xff] %v1356_v48  ;;  %v1358_v19 = vpack.c.bf16 %v932_v18, %v868_v37  ;;  %v837_v54 = vmul.f32 0.25, %v618_v30  ;;  %v933_v55 = vadd.f32 %v901_v29, %v805_v47  ;;  %v2106_v56 = vmul.f32 0.25, %v404_v50 }
  0x64   : > { %1421 = vst [vmem:[%s1984_s9 + $0x98] sm:$0xff] %v1357_v49  ;;  %v2109_v57 = vmul.f32 0.25, %v405_v51  ;;  %v448_v58 = vmul.f32 0.75, %v404_v50  ;;  %v449_v31 = vmul.f32 0.75, %v405_v51  ;;  %v1662_v59 = vunpack.c.h.bf16 %v1710_v45  ;;  %v2135_v49 = vld [vmem:[%s1941_s30 + $0x48] sm:$0xff]  }
  0x65   : > { %1422 = vst [vmem:[%s1984_s9 + $0xa0] sm:$0xff] %v1358_v19  ;;  %v869_v60 = vadd.f32 %v837_v54, %v805_v47  ;;  %v546_v62 = vadd.f32 %v2106_v56, %v2078_v1  ;;  %v406_v63 = vsel %vm391_vm0, %v1661_v52, 0.0  ;;  %v1665_v2 = vunpack.c.l.bf16 %v2103_v53 }
  0x66   : > { %v547_v3 = vadd.f32 %v2109_v57, %v2082_v26  ;;  %v512_v4 = vadd.f32 %v2073_v61, %v448_v58  ;;  %v513_v5 = vadd.f32 %v2076_v0, %v449_v31  ;;  %v407_v6 = vsel %vm391_vm0, %v1662_v59, 0.0 }
  0x67   : > { %v1359_v27 = vpack.c.bf16 %v933_v55, %v869_v60  ;;  %v1001_v7 = vrot.slane %v546_v62, 7  ;;  %v1097_v8 = vrot.slane %v546_v62, 1  ;;  %v1188_v11 = vmul.f32 0.75, %v546_v62 }
  0x68   : > { %v1098_v14 = vrot.slane %v547_v3, 1  ;;  %v1002_v15 = vrot.slane %v547_v3, 7  ;;  %v1189_v1 = vmul.f32 0.75, %v547_v3  ;;  %v619_v16 = vrot.slane %v512_v4, 7 }
  0x69   : > { %1423 = vst [vmem:[%s1984_s9 + $0xa8] sm:$0xff] %v1359_v27  ;;  %v1071_v12 = vsel %vm600_vm1, %v546_v62, %v1001_v7  ;;  %v716_v20 = vrot.slane %v512_v4, 1  ;;  %v717_v21 = vrot.slane %v513_v5, 1  ;;  %v806_v26 = vmul.f32 0.75, %v512_v4 }
  0x6a   : > { %v1099_v61 = vsel %vm697_vm2, %v1097_v8, %v1098_v14  ;;  %v1220_v24 = vmul.f32 0.25, %v1071_v12  ;;  %v1003_v0 = vsel %vm600_vm1, %v1001_v7, %v1002_v15  ;;  %v1167_v25 = vsel %vm697_vm2, %v1098_v14, %v547_v3 }
  0x6b   : > { %v1284_v13 = vmul.f32 0.25, %v1099_v61  ;;  %v1221_v33 = vmul.f32 0.25, %v1003_v0  ;;  %v1285_v9 = vmul.f32 0.25, %v1167_v25  ;;  %v687_v34 = vsel %vm600_vm1, %v512_v4, %v619_v16 }
  0x6c   : > { %v1252_v35 = vadd.f32 %v1220_v24, %v1188_v11  ;;  %v718_v36 = vsel %vm697_vm2, %v716_v20, %v717_v21  ;;  %v838_v38 = vmul.f32 0.25, %v687_v34  ;;  %v620_v10 = vrot.slane %v513_v5, 7 }
  0x6d   : > { %v1316_v39 = vadd.f32 %v1284_v13, %v1188_v11  ;;  %v1253_v40 = vadd.f32 %v1221_v33, %v1189_v1  ;;  %v1317_v41 = vadd.f32 %v1285_v9, %v1189_v1  ;;  %v902_v23 = vmul.f32 0.25, %v718_v36 }
  0x6e   : > { %v870_v42 = vadd.f32 %v838_v38, %v806_v26  ;;  %v621_v32 = vsel %vm600_vm1, %v619_v16, %v620_v10  ;;  %v784_v43 = vsel %vm697_vm2, %v717_v21, %v513_v5  ;;  %v807_v17 = vmul.f32 0.75, %v513_v5 }
  0x6f   : > { %v1360_v44 = vpack.c.bf16 %v1316_v39, %v1252_v35  ;;  %v1361_v22 = vpack.c.bf16 %v1317_v41, %v1253_v40  ;;  %v934_v45 = vadd.f32 %v902_v23, %v806_v26  ;;  %v839_v37 = vmul.f32 0.25, %v621_v32 }
  0x70   : > { %v903_v28 = vmul.f32 0.25, %v784_v43  ;;  %v2130_v46 = vmul.f32 0.25, %v406_v63  ;;  %v2132_v47 = vmul.f32 0.25, %v407_v6  ;;  %v450_v48 = vmul.f32 0.75, %v406_v63 }
  0x71   : > { %1424 = vst [vmem:[%s1984_s9 + $0xb0] sm:$0xff] %v1360_v44  ;;  %v1362_v18 = vpack.c.bf16 %v934_v45, %v870_v42  ;;  %v871_v29 = vadd.f32 %v839_v37, %v807_v17  ;;  %v451_v30 = vmul.f32 0.75, %v407_v6  ;;  %v1666_v50 = vunpack.c.h.bf16 %v2103_v53 }
  0x72   : > { %1425 = vst [vmem:[%s1984_s9 + $0xb8] sm:$0xff] %v1361_v22  ;;  %v935_v51 = vadd.f32 %v903_v28, %v807_v17  ;;  %v548_v52 = vadd.f32 %v2130_v46, %v448_v58  ;;  %v549_v19 = vadd.f32 %v2132_v47, %v449_v31  ;;  %v514_v54 = vadd.f32 %v2106_v56, %v450_v48 }
  0x73   : > { %1426 = vst [vmem:[%s1984_s9 + $0xc0] sm:$0xff] %v1362_v18  ;;  %v515_v55 = vadd.f32 %v2109_v57, %v451_v30  ;;  %v408_v59 = vsel %vm391_vm0, %v1665_v2, 0.0  ;;  %v409_v60 = vsel %vm391_vm0, %v1666_v50, 0.0  ;;  %v1669_v62 = vunpack.c.l.bf16 %v2135_v49 }
  0x74   : > { %v1363_v63 = vpack.c.bf16 %v935_v51, %v871_v29  ;;  %v1004_v53 = vrot.slane %v548_v52, 7  ;;  %v1100_v3 = vrot.slane %v548_v52, 1  ;;  %v1101_v4 = vrot.slane %v549_v19, 1 }
  0x75   : > { %v1190_v5 = vmul.f32 0.75, %v548_v52  ;;  %v1005_v58 = vrot.slane %v549_v19, 7  ;;  %v1191_v6 = vmul.f32 0.75, %v549_v19  ;;  %v622_v27 = vrot.slane %v514_v54, 7 }
  0x76   : > { %1427 = vst [vmem:[%s1984_s9 + $0xc8] sm:$0xff] %v1363_v63  ;;  %v1072_v56 = vsel %vm600_vm1, %v548_v52, %v1004_v53  ;;  %v1102_v31 = vsel %vm697_vm2, %v1100_v3, %v1101_v4  ;;  %v1168_v57 = vsel %vm697_vm2, %v1101_v4, %v549_v19  ;;  %v719_v2 = vrot.slane %v514_v54, 1 }
  0x77   : > { %v1222_v7 = vmul.f32 0.25, %v1072_v56  ;;  %v1286_v8 = vmul.f32 0.25, %v1102_v31  ;;  %v1006_v11 = vsel %vm600_vm1, %v1004_v53, %v1005_v58  ;;  %v1287_v14 = vmul.f32 0.25, %v1168_v57 }
  0x78   : > { %v1223_v15 = vmul.f32 0.25, %v1006_v11  ;;  %v688_v1 = vsel %vm600_vm1, %v514_v54, %v622_v27  ;;  %v720_v16 = vrot.slane %v515_v55, 1  ;;  %v808_v12 = vmul.f32 0.75, %v514_v54  ;;  %v1713_v11 = vld [vmem:[%s1941_s30 + $0x50] sm:$0xff]  }
  0x79   : > { %v1254_v20 = vadd.f32 %v1222_v7, %v1190_v5  ;;  %v1318_v21 = vadd.f32 %v1286_v8, %v1190_v5  ;;  %v1319_v26 = vadd.f32 %v1287_v14, %v1191_v6  ;;  %v840_v61 = vmul.f32 0.25, %v688_v1 }
  0x7a   : > { %v1255_v24 = vadd.f32 %v1223_v15, %v1191_v6  ;;  %v721_v0 = vsel %vm697_vm2, %v719_v2, %v720_v16  ;;  %v623_v25 = vrot.slane %v515_v55, 7  ;;  %v785_v13 = vsel %vm697_vm2, %v720_v16, %v515_v55 }
  0x7b   : > { %v1364_v33 = vpack.c.bf16 %v1318_v21, %v1254_v20  ;;  %v872_v9 = vadd.f32 %v840_v61, %v808_v12  ;;  %v904_v34 = vmul.f32 0.25, %v721_v0  ;;  %v809_v35 = vmul.f32 0.75, %v515_v55 }
  0x7c   : > { %v1365_v36 = vpack.c.bf16 %v1319_v26, %v1255_v24  ;;  %v624_v38 = vsel %vm600_vm1, %v622_v27, %v623_v25  ;;  %v905_v10 = vmul.f32 0.25, %v785_v13  ;;  %v2157_v39 = vmul.f32 0.25, %v408_v59  ;;  %v2190_v13 = vld [vmem:[%s1941_s30 + $0x58] sm:$0xff]  }
  0x7d   : > { %1428 = vst [vmem:[%s1984_s9 + $0xd0] sm:$0xff] %v1364_v33  ;;  %v936_v40 = vadd.f32 %v904_v34, %v808_v12  ;;  %v841_v41 = vmul.f32 0.25, %v624_v38  ;;  %v2160_v23 = vmul.f32 0.25, %v409_v60  ;;  %v2162_v42 = vmul.f32 0.75, %v408_v59 }
  0x7e   : > { %1429 = vst [vmem:[%s1984_s9 + $0xd8] sm:$0xff] %v1365_v36  ;;  %v937_v32 = vadd.f32 %v905_v10, %v809_v35  ;;  %v550_v43 = vadd.f32 %v2157_v39, %v450_v48  ;;  %v2166_v17 = vmul.f32 0.75, %v409_v60  ;;  %v1670_v44 = vunpack.c.h.bf16 %v2135_v49 }
  0x7f   : > { %v1366_v22 = vpack.c.bf16 %v936_v40, %v872_v9  ;;  %v873_v45 = vadd.f32 %v841_v41, %v809_v35  ;;  %v551_v37 = vadd.f32 %v2160_v23, %v451_v30  ;;  %v516_v28 = vadd.f32 %v2130_v46, %v2162_v42 }
  0x80   : > { %v1007_v18 = vrot.slane %v550_v43, 7  ;;  %v1103_v29 = vrot.slane %v550_v43, 1  ;;  %v1192_v50 = vmul.f32 0.75, %v550_v43  ;;  %v517_v51 = vadd.f32 %v2132_v47, %v2166_v17 }
  0x81   : > { %1430 = vst [vmem:[%s1984_s9 + $0xe0] sm:$0xff] %v1366_v22  ;;  %v1367_v48 = vpack.c.bf16 %v937_v32, %v873_v45  ;;  %v1104_v52 = vrot.slane %v551_v37, 1  ;;  %v1008_v19 = vrot.slane %v551_v37, 7  ;;  %v1193_v54 = vmul.f32 0.75, %v551_v37 }
  0x82   : > { %v1073_v55 = vsel %vm600_vm1, %v550_v43, %v1007_v18  ;;  %v625_v59 = vrot.slane %v516_v28, 7  ;;  %v722_v60 = vrot.slane %v516_v28, 1  ;;  %v723_v63 = vrot.slane %v517_v51, 1 }
  0x83   : > { %1431 = vst [vmem:[%s1984_s9 + $0xe8] sm:$0xff] %v1367_v48  ;;  %v1105_v30 = vsel %vm697_vm2, %v1103_v29, %v1104_v52  ;;  %v1224_v46 = vmul.f32 0.25, %v1073_v55  ;;  %v1009_v53 = vsel %vm600_vm1, %v1007_v18, %v1008_v19  ;;  %v1169_v3 = vsel %vm697_vm2, %v1104_v52, %v551_v37 }
  0x84   : > { %v1288_v47 = vmul.f32 0.25, %v1105_v30  ;;  %v1225_v4 = vmul.f32 0.25, %v1009_v53  ;;  %v1289_v5 = vmul.f32 0.25, %v1169_v3  ;;  %v689_v58 = vsel %vm600_vm1, %v516_v28, %v625_v59 }
  0x85   : > { %v1256_v6 = vadd.f32 %v1224_v46, %v1192_v50  ;;  %v724_v27 = vsel %vm697_vm2, %v722_v60, %v723_v63  ;;  %v810_v56 = vmul.f32 0.75, %v516_v28  ;;  %v842_v31 = vmul.f32 0.25, %v689_v58 }
  0x86   : > { %v1320_v57 = vadd.f32 %v1288_v47, %v1192_v50  ;;  %v1257_v2 = vadd.f32 %v1225_v4, %v1193_v54  ;;  %v1321_v7 = vadd.f32 %v1289_v5, %v1193_v54  ;;  %v906_v8 = vmul.f32 0.25, %v724_v27 }
  0x87   : > { %v874_v14 = vadd.f32 %v842_v31, %v810_v56  ;;  %v626_v15 = vrot.slane %v517_v51, 7  ;;  %v786_v1 = vsel %vm697_vm2, %v723_v63, %v517_v51  ;;  %v811_v16 = vmul.f32 0.75, %v517_v51 }
  0x88   : > { %v1368_v12 = vpack.c.bf16 %v1320_v57, %v1256_v6  ;;  %v1369_v20 = vpack.c.bf16 %v1321_v7, %v1257_v2  ;;  %v938_v21 = vadd.f32 %v906_v8, %v810_v56  ;;  %v907_v26 = vmul.f32 0.25, %v786_v1 }
  0x89   : > { %v627_v61 = vsel %vm600_vm1, %v625_v59, %v626_v15  ;;  %v410_v24 = vsel %vm391_vm0, %v1669_v62, 0.0  ;;  %v411_v0 = vsel %vm391_vm0, %v1670_v44, 0.0  ;;  %v1673_v25 = vunpack.c.l.bf16 %v1713_v11 }
  0x8a   : > { %1432 = vst [vmem:[%s1984_s9 + $0xf0] sm:$0xff] %v1368_v12  ;;  %v1370_v33 = vpack.c.bf16 %v938_v21, %v874_v14  ;;  %v843_v9 = vmul.f32 0.25, %v627_v61  ;;  %v939_v34 = vadd.f32 %v907_v26, %v811_v16  ;;  %v2193_v35 = vmul.f32 0.25, %v410_v24 }
  0x8b   : > { %1433 = vst [vmem:[%s1984_s9 + $0xf8] sm:$0xff] %v1369_v20  ;;  %v2196_v36 = vmul.f32 0.25, %v411_v0  ;;  %v454_v38 = vmul.f32 0.75, %v410_v24  ;;  %v455_v10 = vmul.f32 0.75, %v411_v0  ;;  %v1674_v40 = vunpack.c.h.bf16 %v1713_v11  ;;  %v2222_v20 = vld [vmem:[%s1941_s30 + $0x60] sm:$0xff]  }
  0x8c   : > { %1434 = vst [vmem:[%s1984_s9 + $0x100] sm:$0xff] %v1370_v33  ;;  %v875_v49 = vadd.f32 %v843_v9, %v811_v16  ;;  %v552_v62 = vadd.f32 %v2193_v35, %v2162_v42  ;;  %v412_v41 = vsel %vm391_vm0, %v1673_v25, 0.0  ;;  %v1677_v32 = vunpack.c.l.bf16 %v2190_v13 }
  0x8d   : > { %v553_v43 = vadd.f32 %v2196_v36, %v2166_v17  ;;  %v518_v44 = vadd.f32 %v2157_v39, %v454_v38  ;;  %v519_v22 = vadd.f32 %v2160_v23, %v455_v10  ;;  %v413_v45 = vsel %vm391_vm0, %v1674_v40, 0.0 }
  0x8e   : > { %v1371_v37 = vpack.c.bf16 %v939_v34, %v875_v49  ;;  %v1010_v28 = vrot.slane %v552_v62, 7  ;;  %v1106_v18 = vrot.slane %v552_v62, 1  ;;  %v1194_v29 = vmul.f32 0.75, %v552_v62 }
  0x8f   : > { %v1107_v50 = vrot.slane %v553_v43, 1  ;;  %v1011_v51 = vrot.slane %v553_v43, 7  ;;  %v1195_v42 = vmul.f32 0.75, %v553_v43  ;;  %v628_v48 = vrot.slane %v518_v44, 7 }
  0x90   : > { %1435 = vst [vmem:[%s1984_s9 + $0x108] sm:$0xff] %v1371_v37  ;;  %v1074_v52 = vsel %vm600_vm1, %v552_v62, %v1010_v28  ;;  %v725_v19 = vrot.slane %v518_v44, 1  ;;  %v726_v54 = vrot.slane %v519_v22, 1  ;;  %v812_v17 = vmul.f32 0.75, %v518_v44 }
  0x91   : > { %v1108_v39 = vsel %vm697_vm2, %v1106_v18, %v1107_v50  ;;  %v1226_v55 = vmul.f32 0.25, %v1074_v52  ;;  %v1012_v23 = vsel %vm600_vm1, %v1010_v28, %v1011_v51  ;;  %v1170_v59 = vsel %vm697_vm2, %v1107_v50, %v553_v43 }
  0x92   : > { %v1290_v60 = vmul.f32 0.25, %v1108_v39  ;;  %v1227_v63 = vmul.f32 0.25, %v1012_v23  ;;  %v1291_v30 = vmul.f32 0.25, %v1170_v59  ;;  %v690_v46 = vsel %vm600_vm1, %v518_v44, %v628_v48 }
  0x93   : > { %v1258_v53 = vadd.f32 %v1226_v55, %v1194_v29  ;;  %v727_v3 = vsel %vm697_vm2, %v725_v19, %v726_v54  ;;  %v844_v47 = vmul.f32 0.25, %v690_v46  ;;  %v629_v4 = vrot.slane %v519_v22, 7 }
  0x94   : > { %v1322_v5 = vadd.f32 %v1290_v60, %v1194_v29  ;;  %v1259_v58 = vadd.f32 %v1227_v63, %v1195_v42  ;;  %v1323_v6 = vadd.f32 %v1291_v30, %v1195_v42  ;;  %v908_v27 = vmul.f32 0.25, %v727_v3 }
  0x95   : > { %v876_v56 = vadd.f32 %v844_v47, %v812_v17  ;;  %v630_v31 = vsel %vm600_vm1, %v628_v48, %v629_v4  ;;  %v787_v57 = vsel %vm697_vm2, %v726_v54, %v519_v22  ;;  %v813_v2 = vmul.f32 0.75, %v519_v22 }
  0x96   : > { %v1372_v7 = vpack.c.bf16 %v1322_v5, %v1258_v53  ;;  %v1373_v8 = vpack.c.bf16 %v1323_v6, %v1259_v58  ;;  %v940_v11 = vadd.f32 %v908_v27, %v812_v17  ;;  %v845_v14 = vmul.f32 0.25, %v630_v31 }
  0x97   : > { %v909_v15 = vmul.f32 0.25, %v787_v57  ;;  %v2217_v1 = vmul.f32 0.25, %v412_v41  ;;  %v2219_v16 = vmul.f32 0.25, %v413_v45  ;;  %v456_v12 = vmul.f32 0.75, %v412_v41 }
  0x98   : > { %1436 = vst [vmem:[%s1984_s9 + $0x110] sm:$0xff] %v1372_v7  ;;  %v1374_v21 = vpack.c.bf16 %v940_v11, %v876_v56  ;;  %v877_v26 = vadd.f32 %v845_v14, %v813_v2  ;;  %v457_v61 = vmul.f32 0.75, %v413_v45  ;;  %v1678_v24 = vunpack.c.h.bf16 %v2190_v13 }
  0x99   : > { %1437 = vst [vmem:[%s1984_s9 + $0x118] sm:$0xff] %v1373_v8  ;;  %v941_v0 = vadd.f32 %v909_v15, %v813_v2  ;;  %v554_v25 = vadd.f32 %v2217_v1, %v454_v38  ;;  %v555_v33 = vadd.f32 %v2219_v16, %v455_v10  ;;  %v520_v9 = vadd.f32 %v2193_v35, %v456_v12 }
  0x9a   : > { %1438 = vst [vmem:[%s1984_s9 + $0x120] sm:$0xff] %v1374_v21  ;;  %v521_v34 = vadd.f32 %v2196_v36, %v457_v61  ;;  %v414_v40 = vsel %vm391_vm0, %v1677_v32, 0.0  ;;  %v415_v49 = vsel %vm391_vm0, %v1678_v24, 0.0  ;;  %v1681_v62 = vunpack.c.l.bf16 %v2222_v20 }
  0x9b   : > { %v1375_v41 = vpack.c.bf16 %v941_v0, %v877_v26  ;;  %v1013_v13 = vrot.slane %v554_v25, 7  ;;  %v1109_v43 = vrot.slane %v554_v25, 1  ;;  %v1110_v44 = vrot.slane %v555_v33, 1 }
  0x9c   : > { %v1196_v22 = vmul.f32 0.75, %v554_v25  ;;  %v1014_v38 = vrot.slane %v555_v33, 7  ;;  %v1197_v45 = vmul.f32 0.75, %v555_v33  ;;  %v631_v37 = vrot.slane %v520_v9, 7 }
  0x9d   : > { %1439 = vst [vmem:[%s1984_s9 + $0x128] sm:$0xff] %v1375_v41  ;;  %v1075_v35 = vsel %vm600_vm1, %v554_v25, %v1013_v13  ;;  %v1111_v10 = vsel %vm697_vm2, %v1109_v43, %v1110_v44  ;;  %v1171_v36 = vsel %vm697_vm2, %v1110_v44, %v555_v33  ;;  %v728_v32 = vrot.slane %v520_v9, 1 }
  0x9e   : > { %v1228_v28 = vmul.f32 0.25, %v1075_v35  ;;  %v1292_v18 = vmul.f32 0.25, %v1111_v10  ;;  %v1015_v29 = vsel %vm600_vm1, %v1013_v13, %v1014_v38  ;;  %v1293_v50 = vmul.f32 0.25, %v1171_v36 }
  0x9f   : > { %v1229_v51 = vmul.f32 0.25, %v1015_v29  ;;  %v691_v42 = vsel %vm600_vm1, %v520_v9, %v631_v37  ;;  %v729_v48 = vrot.slane %v521_v34, 1  ;;  %v814_v52 = vmul.f32 0.75, %v520_v9  ;;  %v1716_v29 = vld [vmem:[%s1941_s30 + $0x68] sm:$0xff]  }
  0xa0   : > { %v1260_v19 = vadd.f32 %v1228_v28, %v1196_v22  ;;  %v1324_v54 = vadd.f32 %v1292_v18, %v1196_v22  ;;  %v1325_v17 = vadd.f32 %v1293_v50, %v1197_v45  ;;  %v846_v39 = vmul.f32 0.25, %v691_v42 }
  0xa1   : > { %v1261_v55 = vadd.f32 %v1229_v51, %v1197_v45  ;;  %v730_v23 = vsel %vm697_vm2, %v728_v32, %v729_v48  ;;  %v632_v59 = vrot.slane %v521_v34, 7  ;;  %v788_v60 = vsel %vm697_vm2, %v729_v48, %v521_v34 }
  0xa2   : > { %v1376_v63 = vpack.c.bf16 %v1324_v54, %v1260_v19  ;;  %v878_v30 = vadd.f32 %v846_v39, %v814_v52  ;;  %v910_v46 = vmul.f32 0.25, %v730_v23  ;;  %v815_v53 = vmul.f32 0.75, %v521_v34 }
  0xa3   : > { %v1377_v3 = vpack.c.bf16 %v1325_v17, %v1261_v55  ;;  %v633_v47 = vsel %vm600_vm1, %v631_v37, %v632_v59  ;;  %v911_v4 = vmul.f32 0.25, %v788_v60  ;;  %v2244_v5 = vmul.f32 0.25, %v414_v40  ;;  %v2277_v60 = vld [vmem:[%s1941_s30 + $0x70] sm:$0xff]  }
  0xa4   : > { %1440 = vst [vmem:[%s1984_s9 + $0x130] sm:$0xff] %v1376_v63  ;;  %v942_v58 = vadd.f32 %v910_v46, %v814_v52  ;;  %v847_v6 = vmul.f32 0.25, %v633_v47  ;;  %v2247_v27 = vmul.f32 0.25, %v415_v49  ;;  %v2249_v56 = vmul.f32 0.75, %v414_v40 }
  0xa5   : > { %1441 = vst [vmem:[%s1984_s9 + $0x138] sm:$0xff] %v1377_v3  ;;  %v943_v31 = vadd.f32 %v911_v4, %v815_v53  ;;  %v556_v57 = vadd.f32 %v2244_v5, %v456_v12  ;;  %v2253_v2 = vmul.f32 0.75, %v415_v49  ;;  %v1682_v7 = vunpack.c.h.bf16 %v2222_v20 }
  0xa6   : > { %v1378_v8 = vpack.c.bf16 %v942_v58, %v878_v30  ;;  %v879_v11 = vadd.f32 %v847_v6, %v815_v53  ;;  %v557_v14 = vadd.f32 %v2247_v27, %v457_v61  ;;  %v522_v15 = vadd.f32 %v2217_v1, %v2249_v56 }
  0xa7   : > { %v1016_v21 = vrot.slane %v556_v57, 7  ;;  %v1112_v26 = vrot.slane %v556_v57, 1  ;;  %v1198_v24 = vmul.f32 0.75, %v556_v57  ;;  %v523_v0 = vadd.f32 %v2219_v16, %v2253_v2 }
  0xa8   : > { %1442 = vst [vmem:[%s1984_s9 + $0x140] sm:$0xff] %v1378_v8  ;;  %v1379_v12 = vpack.c.bf16 %v943_v31, %v879_v11  ;;  %v1113_v25 = vrot.slane %v557_v14, 1  ;;  %v1017_v33 = vrot.slane %v557_v14, 7  ;;  %v1199_v9 = vmul.f32 0.75, %v557_v14 }
  0xa9   : > { %v1076_v34 = vsel %vm600_vm1, %v556_v57, %v1016_v21  ;;  %v634_v40 = vrot.slane %v522_v15, 7  ;;  %v731_v49 = vrot.slane %v522_v15, 1  ;;  %v732_v41 = vrot.slane %v523_v0, 1 }
  0xaa   : > { %1443 = vst [vmem:[%s1984_s9 + $0x148] sm:$0xff] %v1379_v12  ;;  %v1114_v61 = vsel %vm697_vm2, %v1112_v26, %v1113_v25  ;;  %v1230_v1 = vmul.f32 0.25, %v1076_v34  ;;  %v1018_v13 = vsel %vm600_vm1, %v1016_v21, %v1017_v33  ;;  %v1172_v43 = vsel %vm697_vm2, %v1113_v25, %v557_v14 }
  0xab   : > { %v1294_v16 = vmul.f32 0.25, %v1114_v61  ;;  %v1231_v44 = vmul.f32 0.25, %v1018_v13  ;;  %v1295_v22 = vmul.f32 0.25, %v1172_v43  ;;  %v692_v38 = vsel %vm600_vm1, %v522_v15, %v634_v40 }
  0xac   : > { %v1262_v45 = vadd.f32 %v1230_v1, %v1198_v24  ;;  %v733_v37 = vsel %vm697_vm2, %v731_v49, %v732_v41  ;;  %v816_v35 = vmul.f32 0.75, %v522_v15  ;;  %v848_v10 = vmul.f32 0.25, %v692_v38 }
  0xad   : > { %v1326_v36 = vadd.f32 %v1294_v16, %v1198_v24  ;;  %v1263_v32 = vadd.f32 %v1231_v44, %v1199_v9  ;;  %v1327_v28 = vadd.f32 %v1295_v22, %v1199_v9  ;;  %v912_v18 = vmul.f32 0.25, %v733_v37 }
  0xae   : > { %v880_v50 = vadd.f32 %v848_v10, %v816_v35  ;;  %v635_v51 = vrot.slane %v523_v0, 7  ;;  %v789_v42 = vsel %vm697_vm2, %v732_v41, %v523_v0  ;;  %v817_v48 = vmul.f32 0.75, %v523_v0 }
  0xaf   : > { %v1380_v52 = vpack.c.bf16 %v1326_v36, %v1262_v45  ;;  %v1381_v19 = vpack.c.bf16 %v1327_v28, %v1263_v32  ;;  %v944_v54 = vadd.f32 %v912_v18, %v816_v35  ;;  %v913_v17 = vmul.f32 0.25, %v789_v42 }
  0xb0   : > { %v636_v39 = vsel %vm600_vm1, %v634_v40, %v635_v51  ;;  %v416_v55 = vsel %vm391_vm0, %v1681_v62, 0.0  ;;  %v417_v23 = vsel %vm391_vm0, %v1682_v7, 0.0  ;;  %v1685_v59 = vunpack.c.l.bf16 %v1716_v29 }
  0xb1   : > { %1444 = vst [vmem:[%s1984_s9 + $0x150] sm:$0xff] %v1380_v52  ;;  %v1382_v63 = vpack.c.bf16 %v944_v54, %v880_v50  ;;  %v849_v30 = vmul.f32 0.25, %v636_v39  ;;  %v945_v46 = vadd.f32 %v913_v17, %v817_v48  ;;  %v2280_v53 = vmul.f32 0.25, %v416_v55 }
  0xb2   : > { %1445 = vst [vmem:[%s1984_s9 + $0x158] sm:$0xff] %v1381_v19  ;;  %v2283_v3 = vmul.f32 0.25, %v417_v23  ;;  %v460_v47 = vmul.f32 0.75, %v416_v55  ;;  %v461_v4 = vmul.f32 0.75, %v417_v23  ;;  %v1686_v58 = vunpack.c.h.bf16 %v1716_v29  ;;  %v2309_v19 = vld [vmem:[%s1941_s30 + $0x78] sm:$0xff]   ;;  %s1790_s30 = sshra.s32 %s1485_s28, 4  ;;  %s1791_s30 = int_to_ptr.hbm [resolvable:$true] %s1790_s30 }
  0xb3   : > { %1446 = vst [vmem:[%s1984_s9 + $0x160] sm:$0xff] %v1382_v63  ;;  %v881_v20 = vadd.f32 %v849_v30, %v817_v48  ;;  %v558_v62 = vadd.f32 %v2280_v53, %v2249_v56  ;;  %v418_v6 = vsel %vm391_vm0, %v1685_v59, 0.0  ;;  %v1689_v31 = vunpack.c.l.bf16 %v2277_v60  ;;  %s1792_s4 = scalar_lea.hbm %s1791_s30, 512  ;;  %p1797_p1 = scmp.lt.s32.totalorder %s1791_s30, %s2436_s3 }
  0xb4   : > { %v559_v57 = vadd.f32 %v2283_v3, %v2253_v2  ;;  %v524_v7 = vadd.f32 %v2244_v5, %v460_v47  ;;  %v525_v8 = vadd.f32 %v2247_v27, %v461_v4  ;;  %v419_v11 = vsel %vm391_vm0, %v1686_v58, 0.0  ;;  %p1793_p12 = scmp.ne.s32.totalorder %s1791_s30, %s1792_s4  ;;  %p1798_p2 = scmp.lt.s32.totalorder %s1796_s8, %s1792_s4 }
  0xb5   : > { %v1383_v14 = vpack.c.bf16 %v945_v46, %v881_v20  ;;  %v1019_v15 = vrot.slane %v558_v62, 7  ;;  %v1115_v21 = vrot.slane %v558_v62, 1  ;;  %v1200_v26 = vmul.f32 0.75, %v558_v62 }
  0xb6   : > { %v1116_v24 = vrot.slane %v559_v57, 1  ;;  %v1020_v0 = vrot.slane %v559_v57, 7  ;;  %v1201_v56 = vmul.f32 0.75, %v559_v57  ;;  %v637_v12 = vrot.slane %v524_v7, 7  ;;  %p1794_p13 = pnand %p1793_p12, %p1918_p4  ;;  %p1799_p3 = por %p1798_p2, %p1797_p1 }
  0xb7   : > { %1447 = vst [vmem:[%s1984_s9 + $0x168] sm:$0xff] %v1383_v14  ;;  %v1077_v25 = vsel %vm600_vm1, %v558_v62, %v1019_v15  ;;  %v734_v33 = vrot.slane %v524_v7, 1  ;;  %v735_v9 = vrot.slane %v525_v8, 1  ;;  %v818_v2 = vmul.f32 0.75, %v524_v7 }
  0xb8   : > { %v1117_v5 = vsel %vm697_vm2, %v1115_v21, %v1116_v24  ;;  %v1232_v34 = vmul.f32 0.25, %v1077_v25  ;;  %v1021_v27 = vsel %vm600_vm1, %v1019_v15, %v1020_v0  ;;  %v1173_v40 = vsel %vm697_vm2, %v1116_v24, %v559_v57  ;;  %p1795_p0 = pneg %p1794_p13 }
  0xb9   : > { %v1296_v49 = vmul.f32 0.25, %v1117_v5  ;;  %v1233_v41 = vmul.f32 0.25, %v1021_v27  ;;  %v1297_v61 = vmul.f32 0.25, %v1173_v40  ;;  %v693_v1 = vsel %vm600_vm1, %v524_v7, %v637_v12 }
  0xba   : > { %v1264_v13 = vadd.f32 %v1232_v34, %v1200_v26  ;;  %v736_v43 = vsel %vm697_vm2, %v734_v33, %v735_v9  ;;  %v850_v16 = vmul.f32 0.25, %v693_v1  ;;  %v638_v44 = vrot.slane %v525_v8, 7  ;;  %p1800_p5 = pnand %p1799_p3, %p1795_p0 }
  0xbb   : > { %v1328_v22 = vadd.f32 %v1296_v49, %v1200_v26  ;;  %v1265_v38 = vadd.f32 %v1233_v41, %v1201_v56  ;;  %v1329_v45 = vadd.f32 %v1297_v61, %v1201_v56  ;;  %v914_v37 = vmul.f32 0.25, %v736_v43 }
  0xbc   : > { %v882_v35 = vadd.f32 %v850_v16, %v818_v2  ;;  %v639_v10 = vsel %vm600_vm1, %v637_v12, %v638_v44  ;;  %v790_v36 = vsel %vm697_vm2, %v735_v9, %v525_v8  ;;  %v819_v32 = vmul.f32 0.75, %v525_v8 }
  0xbd   : > { %v1384_v28 = vpack.c.bf16 %v1328_v22, %v1264_v13  ;;  %v1385_v18 = vpack.c.bf16 %v1329_v45, %v1265_v38  ;;  %v946_v29 = vadd.f32 %v914_v37, %v818_v2  ;;  %v851_v50 = vmul.f32 0.25, %v639_v10 }
  0xbe   : > { %v915_v51 = vmul.f32 0.25, %v790_v36  ;;  %v2304_v42 = vmul.f32 0.25, %v418_v6  ;;  %v2306_v48 = vmul.f32 0.25, %v419_v11  ;;  %v462_v52 = vmul.f32 0.75, %v418_v6 }
  0xbf   : > { %1448 = vst [vmem:[%s1984_s9 + $0x170] sm:$0xff] %v1384_v28  ;;  %v1386_v54 = vpack.c.bf16 %v946_v29, %v882_v35  ;;  %v883_v17 = vadd.f32 %v851_v50, %v819_v32  ;;  %v463_v39 = vmul.f32 0.75, %v419_v11  ;;  %v1690_v55 = vunpack.c.h.bf16 %v2277_v60 }
  0xc0   : > { %1449 = vst [vmem:[%s1984_s9 + $0x178] sm:$0xff] %v1385_v18  ;;  %v947_v23 = vadd.f32 %v915_v51, %v819_v32  ;;  %v560_v59 = vadd.f32 %v2304_v42, %v460_v47  ;;  %v561_v63 = vadd.f32 %v2306_v48, %v461_v4  ;;  %v526_v30 = vadd.f32 %v2280_v53, %v462_v52 }
  0xc1   : > { %1450 = vst [vmem:[%s1984_s9 + $0x180] sm:$0xff] %v1386_v54  ;;  %v527_v46 = vadd.f32 %v2283_v3, %v463_v39  ;;  %v420_v58 = vsel %vm391_vm0, %v1689_v31, 0.0  ;;  %v421_v20 = vsel %vm391_vm0, %v1690_v55, 0.0  ;;  %v1693_v62 = vunpack.c.l.bf16 %v2309_v19 }
  0xc2   : > { %v1387_v6 = vpack.c.bf16 %v947_v23, %v883_v17  ;;  %v1022_v60 = vrot.slane %v560_v59, 7  ;;  %v1118_v57 = vrot.slane %v560_v59, 1  ;;  %v1119_v7 = vrot.slane %v561_v63, 1 }
  0xc3   : > { %v1202_v8 = vmul.f32 0.75, %v560_v59  ;;  %v1023_v47 = vrot.slane %v561_v63, 7  ;;  %v1203_v11 = vmul.f32 0.75, %v561_v63  ;;  %v640_v14 = vrot.slane %v526_v30, 7 }
  0xc4   : > { %1451 = vst [vmem:[%s1984_s9 + $0x188] sm:$0xff] %v1387_v6  ;;  %v1078_v53 = vsel %vm600_vm1, %v560_v59, %v1022_v60  ;;  %v1120_v4 = vsel %vm697_vm2, %v1118_v57, %v1119_v7  ;;  %v1174_v3 = vsel %vm697_vm2, %v1119_v7, %v561_v63  ;;  %v737_v31 = vrot.slane %v526_v30, 1 }
  0xc5   : > { %v1234_v15 = vmul.f32 0.25, %v1078_v53  ;;  %v1298_v21 = vmul.f32 0.25, %v1120_v4  ;;  %v1024_v26 = vsel %vm600_vm1, %v1022_v60, %v1023_v47  ;;  %v1299_v24 = vmul.f32 0.25, %v1174_v3 }
  0xc6   : > { %v1235_v0 = vmul.f32 0.25, %v1024_v26  ;;  %v694_v56 = vsel %vm600_vm1, %v526_v30, %v640_v14  ;;  %v738_v12 = vrot.slane %v527_v46, 1  ;;  %v820_v25 = vmul.f32 0.75, %v526_v30  ;;  %v1700_v26 = vld [vmem:[%s321_s19] sm:$0xff]  }
  0xc7   : > { %v1266_v33 = vadd.f32 %v1234_v15, %v1202_v8  ;;  %v1330_v9 = vadd.f32 %v1298_v21, %v1202_v8  ;;  %v1331_v2 = vadd.f32 %v1299_v24, %v1203_v11  ;;  %v852_v5 = vmul.f32 0.25, %v694_v56 }
  0xc8   : > { %v1267_v34 = vadd.f32 %v1235_v0, %v1203_v11  ;;  %v739_v27 = vsel %vm697_vm2, %v737_v31, %v738_v12  ;;  %v641_v40 = vrot.slane %v527_v46, 7  ;;  %v791_v49 = vsel %vm697_vm2, %v738_v12, %v527_v46 }
  0xc9   : > { %v1388_v41 = vpack.c.bf16 %v1330_v9, %v1266_v33  ;;  %v884_v61 = vadd.f32 %v852_v5, %v820_v25  ;;  %v916_v1 = vmul.f32 0.25, %v739_v27  ;;  %v821_v13 = vmul.f32 0.75, %v527_v46 }
  0xca   : > { %v1389_v43 = vpack.c.bf16 %v1331_v2, %v1267_v34  ;;  %v642_v16 = vsel %vm600_vm1, %v640_v14, %v641_v40  ;;  %v917_v44 = vmul.f32 0.25, %v791_v49  ;;  %v2331_v22 = vmul.f32 0.25, %v420_v58 }
  0xcb   : > { %1452 = vst [vmem:[%s1984_s9 + $0x190] sm:$0xff] %v1388_v41  ;;  %v948_v38 = vadd.f32 %v916_v1, %v820_v25  ;;  %v853_v45 = vmul.f32 0.25, %v642_v16  ;;  %v2334_v37 = vmul.f32 0.25, %v421_v20  ;;  %v2336_v35 = vmul.f32 0.75, %v420_v58 }
  0xcc   : > { %1453 = vst [vmem:[%s1984_s9 + $0x198] sm:$0xff] %v1389_v43  ;;  %v949_v10 = vadd.f32 %v917_v44, %v821_v13  ;;  %v562_v36 = vadd.f32 %v2331_v22, %v462_v52  ;;  %v2340_v32 = vmul.f32 0.75, %v421_v20  ;;  %v1694_v28 = vunpack.c.h.bf16 %v2309_v19 }
  0xcd   : > { %v1390_v18 = vpack.c.bf16 %v948_v38, %v884_v61  ;;  %v885_v29 = vadd.f32 %v853_v45, %v821_v13  ;;  %v563_v50 = vadd.f32 %v2334_v37, %v463_v39  ;;  %v528_v51 = vadd.f32 %v2304_v42, %v2336_v35 }
  0xce   : > { %v1025_v54 = vrot.slane %v562_v36, 7  ;;  %v1121_v17 = vrot.slane %v562_v36, 1  ;;  %v1204_v55 = vmul.f32 0.75, %v562_v36  ;;  %v529_v23 = vadd.f32 %v2306_v48, %v2340_v32 }
  0xcf   : > { %1454 = vst [vmem:[%s1984_s9 + $0x1a0] sm:$0xff] %v1390_v18  ;;  %v1391_v52 = vpack.c.bf16 %v949_v10, %v885_v29  ;;  %v1122_v59 = vrot.slane %v563_v50, 1  ;;  %v1026_v63 = vrot.slane %v563_v50, 7  ;;  %v1205_v30 = vmul.f32 0.75, %v563_v50 }
  0xd0   : > { %v1079_v46 = vsel %vm600_vm1, %v562_v36, %v1025_v54  ;;  %v643_v58 = vrot.slane %v528_v51, 7  ;;  %v740_v39 = vrot.slane %v528_v51, 1  ;;  %v741_v20 = vrot.slane %v529_v23, 1 }
  0xd1   : > { %1455 = vst [vmem:[%s1984_s9 + $0x1a8] sm:$0xff] %v1391_v52  ;;  %v1123_v42 = vsel %vm697_vm2, %v1121_v17, %v1122_v59  ;;  %v1236_v6 = vmul.f32 0.25, %v1079_v46  ;;  %v1027_v60 = vsel %vm600_vm1, %v1025_v54, %v1026_v63  ;;  %v1175_v57 = vsel %vm697_vm2, %v1122_v59, %v563_v50 }
  0xd2   : > { %v1300_v48 = vmul.f32 0.25, %v1123_v42  ;;  %v1237_v7 = vmul.f32 0.25, %v1027_v60  ;;  %v1301_v8 = vmul.f32 0.25, %v1175_v57  ;;  %v695_v47 = vsel %vm600_vm1, %v528_v51, %v643_v58 }
  0xd3   : > { %v1268_v11 = vadd.f32 %v1236_v6, %v1204_v55  ;;  %v742_v14 = vsel %vm697_vm2, %v740_v39, %v741_v20  ;;  %v822_v53 = vmul.f32 0.75, %v528_v51  ;;  %v854_v4 = vmul.f32 0.25, %v695_v47 }
  0xd4   : > { %v1332_v3 = vadd.f32 %v1300_v48, %v1204_v55  ;;  %v1269_v31 = vadd.f32 %v1237_v7, %v1205_v30  ;;  %v1333_v15 = vadd.f32 %v1301_v8, %v1205_v30  ;;  %v918_v21 = vmul.f32 0.25, %v742_v14 }
  0xd5   : > { %v886_v24 = vadd.f32 %v854_v4, %v822_v53  ;;  %v644_v0 = vrot.slane %v529_v23, 7  ;;  %v792_v56 = vsel %vm697_vm2, %v741_v20, %v529_v23  ;;  %v823_v12 = vmul.f32 0.75, %v529_v23 }
  0xd6   : > { %v1392_v25 = vpack.c.bf16 %v1332_v3, %v1268_v11  ;;  %v1393_v33 = vpack.c.bf16 %v1333_v15, %v1269_v31  ;;  %v950_v9 = vadd.f32 %v918_v21, %v822_v53  ;;  %v919_v2 = vmul.f32 0.25, %v792_v56 }
  0xd7   : > { %v645_v5 = vsel %vm600_vm1, %v643_v58, %v644_v0  ;;  %v422_v34 = vsel %vm391_vm0, %v1693_v62, 0.0  ;;  %v423_v27 = vsel %vm391_vm0, %v1694_v28, 0.0  ;;  %v1701_v40 = vunpack.c.l.bf16 %v1700_v26 }
  0xd8   : > { %1456 = vst [vmem:[%s1984_s9 + $0x1b0] sm:$0xff] %v1392_v25  ;;  %v1394_v49 = vpack.c.bf16 %v950_v9, %v886_v24  ;;  %v855_v41 = vmul.f32 0.25, %v645_v5  ;;  %v951_v61 = vadd.f32 %v919_v2, %v823_v12  ;;  %v532_v1 = vmul.f32 0.25, %v422_v34 }
  0xd9   : > { %1457 = vst [vmem:[%s1984_s9 + $0x1b8] sm:$0xff] %v1393_v33  ;;  %v533_v13 = vmul.f32 0.25, %v423_v27  ;;  %v466_v43 = vmul.f32 0.75, %v422_v34  ;;  %v467_v16 = vmul.f32 0.75, %v423_v27  ;;  %v1702_v44 = vunpack.c.h.bf16 %v1700_v26 }
  0xda   : > { %1458 = vst [vmem:[%s1984_s9 + $0x1c0] sm:$0xff] %v1394_v49  ;;  %v887_v38 = vadd.f32 %v855_v41, %v823_v12  ;;  %v564_v19 = vadd.f32 %v532_v1, %v2336_v35  ;;  %v434_v62 = vsel %vm391_vm0, %v1701_v40, 0.0 }
  0xdb   : > { %v565_v45 = vadd.f32 %v533_v13, %v2340_v32  ;;  %v530_v10 = vadd.f32 %v2331_v22, %v466_v43  ;;  %v531_v36 = vadd.f32 %v2334_v37, %v467_v16  ;;  %v435_v28 = vsel %vm391_vm0, %v1702_v44, 0.0 }
  0xdc   : > { %v1395_v18 = vpack.c.bf16 %v951_v61, %v887_v38  ;;  %v1028_v29 = vrot.slane %v564_v19, 7  ;;  %v1124_v50 = vrot.slane %v564_v19, 1  ;;  %v1206_v51 = vmul.f32 0.75, %v564_v19 }
  0xdd   : > { %v1125_v54 = vrot.slane %v565_v45, 1  ;;  %v1029_v17 = vrot.slane %v565_v45, 7  ;;  %v1207_v55 = vmul.f32 0.75, %v565_v45  ;;  %v646_v23 = vrot.slane %v530_v10, 7 }
  0xde   : > { %1459 = vst [vmem:[%s1984_s9 + $0x1c8] sm:$0xff] %v1395_v18  ;;  %v1080_v35 = vsel %vm600_vm1, %v564_v19, %v1028_v29  ;;  %v743_v52 = vrot.slane %v530_v10, 1  ;;  %v744_v59 = vrot.slane %v531_v36, 1  ;;  %v824_v32 = vmul.f32 0.75, %v530_v10 }
  0xdf   : > { %v1126_v22 = vsel %vm697_vm2, %v1124_v50, %v1125_v54  ;;  %v1238_v63 = vmul.f32 0.25, %v1080_v35  ;;  %v1030_v37 = vsel %vm600_vm1, %v1028_v29, %v1029_v17  ;;  %v1176_v30 = vsel %vm697_vm2, %v1125_v54, %v565_v45 }
  0xe0   : > { %v1302_v46 = vmul.f32 0.25, %v1126_v22  ;;  %v1239_v58 = vmul.f32 0.25, %v1030_v37  ;;  %v1303_v39 = vmul.f32 0.25, %v1176_v30  ;;  %v696_v20 = vsel %vm600_vm1, %v530_v10, %v646_v23 }
  0xe1   : > { %v1270_v42 = vadd.f32 %v1238_v63, %v1206_v51  ;;  %v745_v6 = vsel %vm697_vm2, %v743_v52, %v744_v59  ;;  %v856_v60 = vmul.f32 0.25, %v696_v20  ;;  %v647_v57 = vrot.slane %v531_v36, 7 }
  0xe2   : > { %v1334_v48 = vadd.f32 %v1302_v46, %v1206_v51  ;;  %v1271_v7 = vadd.f32 %v1239_v58, %v1207_v55  ;;  %v1335_v8 = vadd.f32 %v1303_v39, %v1207_v55  ;;  %v920_v47 = vmul.f32 0.25, %v745_v6 }
  0xe3   : > { %v888_v11 = vadd.f32 %v856_v60, %v824_v32  ;;  %v648_v14 = vsel %vm600_vm1, %v646_v23, %v647_v57  ;;  %v793_v53 = vsel %vm697_vm2, %v744_v59, %v531_v36  ;;  %v825_v4 = vmul.f32 0.75, %v531_v36 }
  0xe4   : > { %v1396_v3 = vpack.c.bf16 %v1334_v48, %v1270_v42  ;;  %v1397_v31 = vpack.c.bf16 %v1335_v8, %v1271_v7  ;;  %v952_v15 = vadd.f32 %v920_v47, %v824_v32  ;;  %v857_v21 = vmul.f32 0.25, %v648_v14 }
  0xe5   : > { %v921_v26 = vmul.f32 0.25, %v793_v53  ;;  %v534_v24 = vmul.f32 0.25, %v434_v62  ;;  %v535_v0 = vmul.f32 0.25, %v435_v28 }
  0xe6   : > { %1460 = vst [vmem:[%s1984_s9 + $0x1d0] sm:$0xff] %v1396_v3  ;;  %v1398_v56 = vpack.c.bf16 %v952_v15, %v888_v11  ;;  %v889_v12 = vadd.f32 %v857_v21, %v825_v4 }
  0xe7   : > { %1461 = vst [vmem:[%s1984_s9 + $0x1d8] sm:$0xff] %v1397_v31  ;;  %v953_v25 = vadd.f32 %v921_v26, %v825_v4  ;;  %v566_v33 = vadd.f32 %v534_v24, %v466_v43  ;;  %v567_v9 = vadd.f32 %v535_v0, %v467_v16 }
  0xe8   : > { %1462 = vst [vmem:[%s1984_s9 + $0x1e0] sm:$0xff] %v1398_v56 }
  0xe9   : > { %v1399_v2 = vpack.c.bf16 %v953_v25, %v889_v12  ;;  %v1031_v5 = vrot.slane %v566_v33, 7  ;;  %v1127_v34 = vrot.slane %v566_v33, 1  ;;  %v1128_v27 = vrot.slane %v567_v9, 1 }
  0xea   : > { %v1208_v40 = vmul.f32 0.75, %v566_v33  ;;  %v1032_v49 = vrot.slane %v567_v9, 7  ;;  %v1209_v41 = vmul.f32 0.75, %v567_v9 }
  0xeb   : > { %1463 = vst [vmem:[%s1984_s9 + $0x1e8] sm:$0xff] %v1399_v2  ;;  %v1081_v61 = vsel %vm600_vm1, %v566_v33, %v1031_v5  ;;  %v1129_v1 = vsel %vm697_vm2, %v1127_v34, %v1128_v27  ;;  %v1177_v13 = vsel %vm697_vm2, %v1128_v27, %v567_v9 }
  0xec   : > { %v1240_v43 = vmul.f32 0.25, %v1081_v61  ;;  %v1304_v16 = vmul.f32 0.25, %v1129_v1  ;;  %v1033_v44 = vsel %vm600_vm1, %v1031_v5, %v1032_v49  ;;  %v1305_v38 = vmul.f32 0.25, %v1177_v13 }
  0xed   : > { %v1241_v19 = vmul.f32 0.25, %v1033_v44 }
  0xee   : > { %v1272_v62 = vadd.f32 %v1240_v43, %v1208_v40  ;;  %v1336_v45 = vadd.f32 %v1304_v16, %v1208_v40  ;;  %v1337_v10 = vadd.f32 %v1305_v38, %v1209_v41 }
  0xef   : > { %v1273_v36 = vadd.f32 %v1241_v19, %v1209_v41 }
  0xf0   : > { %v1400_v28 = vpack.c.bf16 %v1336_v45, %v1272_v62 }
  0xf1   : > { %v1401_v18 = vpack.c.bf16 %v1337_v10, %v1273_v36 }
  0xf2   : > { %1464 = vst [vmem:[%s1984_s9 + $0x1f0] sm:$0xff] %v1400_v28 }
  0xf3   : > { %1465 = vst [vmem:[%s1984_s9 + $0x1f8] sm:$0xff] %v1401_v18 }
  0xf4   : > { %1803 = shalt.err (!%p1800_p5)
}
  0xf5   : > { %s1856_s7 = smov 128   ;;  %s1857_s9 = smov 8  }
  0xf6   : > { %1719 = dma.vmem_to_hbm [thread:$0]  (%p1918_p4), %s1483_s15, 8192, %s1485_s28, %s1467_s29, %s1856_s7, %s1856_s7, %s1857_s9  }
  0xf7 PF: > { %p1725_p6 = scmp.ge.s32.totalorder %s1854_s17, 2  ;;  %s1499_s18 = sand.u32 1, %s1834_s12  }
  0xf8   : > { %s1500_s19 = scalar_lea.sflag [#allocation3], %s1499_s18 }
  0xf9   : > { %p1722_p7 = pnand %p1725_p6, %p1925_p8 }
  0xfb   : > { %p1723_p9 = pneg %p1722_p7 }
  0xfd   : > { %1829 = dma.done.wait (%p1723_p9), %s1500_s19, 8192  }
  0xfe   : > { %1831 = vsyncadd (%p1723_p9), %s1500_s19, 4294959104  ;;  %s16_s17 = sadd.s32 1, %s1854_s17   ;;  %s2439_s12 = smov %s1838_s13 }
  0xff   : > { %p13_p10 = scmp.ge.s32.totalorder %s16_s17, 4   ;;  %s2440_s13 = smov %s1842_s14 }
 0x100   : > { %s2441_s14 = smov %s1931_s25  ;;  %s2442_s15 = smov %s1850_s16 }
 0x101   : > { %s2443_s16 = smov %s2445_s20  ;;  %15 = sbr.rel (!%p13_p10) target bundleno = 4 (0x4), region = 73 }
 0x106   :  { %1506 = vsyncpa [#allocation3], 1 }
 0x107   :  { %1508 = vsyncpa [#allocation3 + $0x1], 1 }

</bundles_post_ra>
